<compile_context>
chip_gen: v7x
topology: tpu7x:2x2x1
jax: 0.10.0
libtpu: 0.0.40
codegen_flags: <defaults>
</compile_context>

<pallas_src>
import math

import jax
import jax.numpy as jnp
from jax.experimental import pallas as pl
from jax.experimental.pallas import tpu as pltpu

# ---- small DistilBERT-style config ----
VOCAB = 100
MAX_POS = 16
B, S, D = 2, 8, 32          # batch (sentences), seq, hidden
H = 4                       # heads
DH = D // H                 # head dim
FFN = 64                    # intermediate size
LAYERS = 2
LN_EPS = 1e-12
NEG_INF = -1e9


# ---------------- fused Pallas kernel (one sentence per grid step) ----------------

def _layernorm(x, g, b):
    # LayerNorm over the last (hidden) dim of an (S, D) matrix
    mu = jnp.mean(x, axis=-1, keepdims=True)
    xc = x - mu
    var = jnp.mean(xc * xc, axis=-1, keepdims=True)
    return xc * jax.lax.rsqrt(var + LN_EPS) * g + b


def _encoder_kernel(x_ref, mask_ref,
                    eg_ref, eb_ref,
                    qkvw_ref, qkvb_ref, ow_ref, ob_ref,
                    l1g_ref, l1b_ref, f1w_ref, f1b_ref,
                    f2w_ref, f2b_ref, l2g_ref, l2b_ref,
                    out_ref):
    # --- embeddings (word + pos already summed on host) + LayerNorm ---
    h = _layernorm(x_ref[0], eg_ref[...], eb_ref[...])               # (S, D)

    # key-padding bias built in-kernel from the (1, S) mask row; broadcasts over query rows.
    key_bias = (1.0 - mask_ref[0]) * NEG_INF                         # (1, S)

    for l in range(LAYERS):                                          # unrolled (LAYERS=2)
        # --- multi-head self attention, fused QKV projection (scale folded into W_q) ---
        qkv = jnp.dot(h, qkvw_ref[l],
                      preferred_element_type=jnp.float32) + qkvb_ref[l]   # (S, 3D)
        ow_l = ow_ref[l]                                             # (D, D)
        attn_out = jnp.zeros((S, D), jnp.float32)
        for hh in range(H):                                          # unrolled (H=4)
            q = qkv[:, hh * DH:(hh + 1) * DH]                        # (S, DH)
            k = qkv[:, D + hh * DH:D + (hh + 1) * DH]
            v = qkv[:, 2 * D + hh * DH:2 * D + (hh + 1) * DH]
            s = jax.lax.dot_general(q, k, (((1,), (1,)), ((), ())),
                                    preferred_element_type=jnp.float32)   # (S, S)
            s = s + key_bias
            s = s - jnp.max(s, axis=-1, keepdims=True)
            p = jnp.exp(s)
            p = p * pl.reciprocal(jnp.sum(p, axis=-1, keepdims=True), approx=True)
            ctx = jnp.dot(p, v, preferred_element_type=jnp.float32)  # (S, DH)
            # accumulate the per-head output projection (no concat / lane shuffle)
            attn_out = attn_out + jnp.dot(ctx, ow_l[hh * DH:(hh + 1) * DH, :],
                                          preferred_element_type=jnp.float32)
        attn_out = attn_out + ob_ref[l]
        h = _layernorm(attn_out + h, l1g_ref[l], l1b_ref[l])

        # --- feed-forward ---
        f = jnp.dot(h, f1w_ref[l],
                    preferred_element_type=jnp.float32) + f1b_ref[l]
        # TODO(synk): DistilBERT uses erf-GELU; tanh approximation keeps EUP-only ops.
        f = jax.nn.gelu(f, approximate=True)
        f = jnp.dot(f, f2w_ref[l],
                    preferred_element_type=jnp.float32) + f2b_ref[l]
        h = _layernorm(f + h, l2g_ref[l], l2b_ref[l])

    # last_hidden_state.mean(dim=1): uniform mean over S (includes padded positions,
    # exactly like the PyTorch reference).
    out_ref[0] = jnp.mean(h, axis=0, keepdims=True)                  # (1, D)


# ---------------- parameters (deterministic synthetic init) ----------------

def init_params(key):
    def nrm(k, shape, scale=0.02):
        return scale * jax.random.normal(k, shape, dtype=jnp.float32)

    attn_scale = 1.0 / math.sqrt(DH)
    keys = iter(jax.random.split(key, 2 + LAYERS * 6))
    params = {
        "word_emb": nrm(next(keys), (VOCAB, D)),
        "pos_emb": nrm(next(keys), (MAX_POS, D)),
        "emb_ln_g": jnp.ones((1, D), jnp.float32),
        "emb_ln_b": jnp.zeros((1, D), jnp.float32),
    }
    qkv_w, o_w, f1_w, f2_w = [], [], [], []
    for _ in range(LAYERS):
        # fold 1/sqrt(DH) into the Q columns (Q bias is zero, so this is exact)
        q = nrm(next(keys), (D, D)) * attn_scale
        k = nrm(next(keys), (D, D))
        v = nrm(next(keys), (D, D))
        qkv_w.append(jnp.concatenate([q, k, v], axis=1))             # (D, 3D) fused
        o_w.append(nrm(next(keys), (D, D)))
        f1_w.append(nrm(next(keys), (D, FFN)))
        f2_w.append(nrm(next(keys), (FFN, D)))
    params.update({
        "qkv_w": jnp.stack(qkv_w),                                   # (L, D, 3D)
        "qkv_b": jnp.zeros((LAYERS, 1, 3 * D), jnp.float32),
        "o_w": jnp.stack(o_w),                                       # (L, D, D)
        "o_b": jnp.zeros((LAYERS, 1, D), jnp.float32),
        "ln1_g": jnp.ones((LAYERS, 1, D), jnp.float32),
        "ln1_b": jnp.zeros((LAYERS, 1, D), jnp.float32),
        "f1_w": jnp.stack(f1_w),                                     # (L, D, FFN)
        "f1_b": jnp.zeros((LAYERS, 1, FFN), jnp.float32),
        "f2_w": jnp.stack(f2_w),                                     # (L, FFN, D)
        "f2_b": jnp.zeros((LAYERS, 1, D), jnp.float32),
        "ln2_g": jnp.ones((LAYERS, 1, D), jnp.float32),
        "ln2_b": jnp.zeros((LAYERS, 1, D), jnp.float32),
    })
    return params


# ---------------- forward pass (embedding gather + ONE pallas_call) ----------------

_WEIGHT_NAMES = ("emb_ln_g", "emb_ln_b",
                 "qkv_w", "qkv_b", "o_w", "o_b",
                 "ln1_g", "ln1_b", "f1_w", "f1_b",
                 "f2_w", "f2_b", "ln2_g", "ln2_b")


def _full_block(arr):
    # whole array resident in VMEM, same block for every grid step
    ndim = arr.ndim
    return pl.BlockSpec(arr.shape, lambda b, _n=ndim: (0,) * _n)


@jax.jit
def sentence_transformer_forward(params, input_ids, attention_mask):
    # embedding lookup + positional add (single XLA gather; see TODO above)
    we = jnp.take(params["word_emb"], input_ids, axis=0)             # (B, S, D)
    pe = params["pos_emb"][:S][None, :, :]                           # (1, S, D)
    x0 = (we + pe).astype(jnp.float32)                               # (B, S, D)

    mask = attention_mask.astype(jnp.float32).reshape(B, 1, S)       # (B, 1, S)
    weights = [params[n] for n in _WEIGHT_NAMES]

    out = pl.pallas_call(
        _encoder_kernel,
        out_shape=jax.ShapeDtypeStruct((B, 1, D), jnp.float32),
        grid=(B,),
        in_specs=[pl.BlockSpec((1, S, D), lambda b: (b, 0, 0)),      # one sentence's embeddings
                  pl.BlockSpec((1, 1, S), lambda b: (b, 0, 0))]      # its attention-mask row
                 + [_full_block(w) for w in weights],                # weights resident in VMEM
        out_specs=pl.BlockSpec((1, 1, D), lambda b: (b, 0, 0)),
        compiler_params=pltpu.CompilerParams(
            dimension_semantics=("parallel",)),                      # v7x: split batch over TCs
    )(x0, mask, *weights)
    return out.reshape(B, D)


if __name__ == "__main__":
    key = jax.random.PRNGKey(0)
    k_param, k_ids = jax.random.split(key)
    params = init_params(k_param)

    input_ids = jax.random.randint(k_ids, (B, S), 0, VOCAB, dtype=jnp.int32)
    # second sentence padded at the last two positions
    attention_mask = jnp.array(
        [[1, 1, 1, 1, 1, 1, 1, 1],
         [1, 1, 1, 1, 1, 1, 0, 0]], dtype=jnp.int32)

    out = sentence_transformer_forward(params, input_ids, attention_mask)
    out = jax.block_until_ready(out)
    assert out.shape == (B, D) and out.dtype == jnp.float32
    assert bool(jnp.all(jnp.isfinite(out)))
    print("KERNEL_OK")
</pallas_src>

<mosaic_0001>
module attributes {stable_mosaic.version = 11 : i64} {
  func.func @_encoder_kernel(%arg0: i32, %arg1: memref<1x8x32xf32, #tpu.memory_space<vmem>>, %arg2: memref<1x1x8xf32, #tpu.memory_space<vmem>>, %arg3: memref<1x32xf32, #tpu.memory_space<vmem>>, %arg4: memref<1x32xf32, #tpu.memory_space<vmem>>, %arg5: memref<2x32x96xf32, #tpu.memory_space<vmem>>, %arg6: memref<2x1x96xf32, #tpu.memory_space<vmem>>, %arg7: memref<2x32x32xf32, #tpu.memory_space<vmem>>, %arg8: memref<2x1x32xf32, #tpu.memory_space<vmem>>, %arg9: memref<2x1x32xf32, #tpu.memory_space<vmem>>, %arg10: memref<2x1x32xf32, #tpu.memory_space<vmem>>, %arg11: memref<2x32x64xf32, #tpu.memory_space<vmem>>, %arg12: memref<2x1x64xf32, #tpu.memory_space<vmem>>, %arg13: memref<2x64x32xf32, #tpu.memory_space<vmem>>, %arg14: memref<2x1x32xf32, #tpu.memory_space<vmem>>, %arg15: memref<2x1x32xf32, #tpu.memory_space<vmem>>, %arg16: memref<2x1x32xf32, #tpu.memory_space<vmem>>, %arg17: memref<1x1x32xf32, #tpu.memory_space<vmem>>) attributes {dimension_semantics = [#tpu.dimension_semantics<parallel>], iteration_bounds = array<i64: 2>, scalar_prefetch = 0 : i64, scratch_operands = 0 : i64, tpu.core_type = #tpu.core_type<tc>, window_params = [{transform_indices = @transform_0, window_bounds = array<i64: 1, 8, 32>}, {transform_indices = @transform_1, window_bounds = array<i64: 1, 1, 8>}, {pipeline_mode = #tpu.pipeline_mode<synchronous>, transform_indices = @transform_2, window_bounds = array<i64: 1, 32>}, {pipeline_mode = #tpu.pipeline_mode<synchronous>, transform_indices = @transform_3, window_bounds = array<i64: 1, 32>}, {pipeline_mode = #tpu.pipeline_mode<synchronous>, transform_indices = @transform_4, window_bounds = array<i64: 2, 32, 96>}, {pipeline_mode = #tpu.pipeline_mode<synchronous>, transform_indices = @transform_5, window_bounds = array<i64: 2, 1, 96>}, {pipeline_mode = #tpu.pipeline_mode<synchronous>, transform_indices = @transform_6, window_bounds = array<i64: 2, 32, 32>}, {pipeline_mode = #tpu.pipeline_mode<synchronous>, transform_indices = @transform_7, window_bounds = array<i64: 2, 1, 32>}, {pipeline_mode = #tpu.pipeline_mode<synchronous>, transform_indices = @transform_8, window_bounds = array<i64: 2, 1, 32>}, {pipeline_mode = #tpu.pipeline_mode<synchronous>, transform_indices = @transform_9, window_bounds = array<i64: 2, 1, 32>}, {pipeline_mode = #tpu.pipeline_mode<synchronous>, transform_indices = @transform_10, window_bounds = array<i64: 2, 32, 64>}, {pipeline_mode = #tpu.pipeline_mode<synchronous>, transform_indices = @transform_11, window_bounds = array<i64: 2, 1, 64>}, {pipeline_mode = #tpu.pipeline_mode<synchronous>, transform_indices = @transform_12, window_bounds = array<i64: 2, 64, 32>}, {pipeline_mode = #tpu.pipeline_mode<synchronous>, transform_indices = @transform_13, window_bounds = array<i64: 2, 1, 32>}, {pipeline_mode = #tpu.pipeline_mode<synchronous>, transform_indices = @transform_14, window_bounds = array<i64: 2, 1, 32>}, {pipeline_mode = #tpu.pipeline_mode<synchronous>, transform_indices = @transform_15, window_bounds = array<i64: 2, 1, 32>}, {transform_indices = @transform_16, window_bounds = array<i64: 1, 1, 32>}]} {
    %c0 = arith.constant 0 : index
    %c0_0 = arith.constant 0 : index
    %c0_1 = arith.constant 0 : index
    %0 = vector.load %arg1[%c0, %c0_0, %c0_1] : memref<1x8x32xf32, #tpu.memory_space<vmem>>, vector<1x8x32xf32>
    %1 = vector.shape_cast %0 : vector<1x8x32xf32> to vector<8x32xf32>
    %c0_2 = arith.constant 0 : index
    %c0_3 = arith.constant 0 : index
    %2 = vector.load %arg3[%c0_2, %c0_3] : memref<1x32xf32, #tpu.memory_space<vmem>>, vector<1x32xf32>
    %c0_4 = arith.constant 0 : index
    %c0_5 = arith.constant 0 : index
    %3 = vector.load %arg4[%c0_4, %c0_5] : memref<1x32xf32, #tpu.memory_space<vmem>>, vector<1x32xf32>
    %cst = arith.constant dense<0.000000e+00> : vector<8xf32>
    %4 = vector.multi_reduction <add>, %1, %cst [1] : vector<8x32xf32> to vector<8xf32>
    %5 = vector.shape_cast %4 : vector<8xf32> to vector<8x1xf32>
    %cst_6 = arith.constant 3.200000e+01 : f32
    %6 = vector.broadcast %cst_6 : f32 to vector<8x1xf32>
    %7 = arith.divf %5, %6 : vector<8x1xf32>
    %8 = vector.broadcast %7 : vector<8x1xf32> to vector<8x32xf32>
    %9 = arith.subf %1, %8 : vector<8x32xf32>
    %10 = arith.mulf %9, %9 : vector<8x32xf32>
    %cst_7 = arith.constant dense<0.000000e+00> : vector<8xf32>
    %11 = vector.multi_reduction <add>, %10, %cst_7 [1] : vector<8x32xf32> to vector<8xf32>
    %12 = vector.shape_cast %11 : vector<8xf32> to vector<8x1xf32>
    %cst_8 = arith.constant 3.200000e+01 : f32
    %13 = vector.broadcast %cst_8 : f32 to vector<8x1xf32>
    %14 = arith.divf %12, %13 : vector<8x1xf32>
    %cst_9 = arith.constant 9.99999996E-13 : f32
    %15 = vector.broadcast %cst_9 : f32 to vector<8x1xf32>
    %16 = arith.addf %14, %15 : vector<8x1xf32>
    %17 = math.rsqrt %16 : vector<8x1xf32>
    %18 = vector.broadcast %17 : vector<8x1xf32> to vector<8x32xf32>
    %19 = arith.mulf %9, %18 : vector<8x32xf32>
    %20 = vector.broadcast %2 : vector<1x32xf32> to vector<8x32xf32>
    %21 = arith.mulf %19, %20 : vector<8x32xf32>
    %22 = vector.broadcast %3 : vector<1x32xf32> to vector<8x32xf32>
    %23 = arith.addf %21, %22 : vector<8x32xf32>
    %c0_10 = arith.constant 0 : index
    %c0_11 = arith.constant 0 : index
    %c0_12 = arith.constant 0 : index
    %24 = vector.load %arg2[%c0_10, %c0_11, %c0_12] : memref<1x1x8xf32, #tpu.memory_space<vmem>>, vector<1x1x8xf32>
    %25 = vector.shape_cast %24 : vector<1x1x8xf32> to vector<1x8xf32>
    %cst_13 = arith.constant 1.000000e+00 : f32
    %26 = vector.broadcast %cst_13 : f32 to vector<1x8xf32>
    %27 = arith.subf %26, %25 : vector<1x8xf32>
    %cst_14 = arith.constant -1.000000e+09 : f32
    %28 = vector.broadcast %cst_14 : f32 to vector<1x8xf32>
    %29 = arith.mulf %27, %28 : vector<1x8xf32>
    %c0_15 = arith.constant 0 : index
    %c0_16 = arith.constant 0 : index
    %c0_17 = arith.constant 0 : index
    %30 = vector.load %arg5[%c0_15, %c0_16, %c0_17] : memref<2x32x96xf32, #tpu.memory_space<vmem>>, vector<1x32x96xf32>
    %31 = vector.shape_cast %30 : vector<1x32x96xf32> to vector<32x96xf32>
    %cst_18 = arith.constant dense<0.000000e+00> : vector<8x96xf32>
    %32 = tpu.matmul %23, %31, %cst_18 {dimension_numbers = #tpu.dot_dimension_numbers<[1], [0], [0], [1], [0, 0, 1, 1], [], []>} : vector<8x32xf32>, vector<32x96xf32>, vector<8x96xf32> -> vector<8x96xf32>
    %c0_19 = arith.constant 0 : index
    %c0_20 = arith.constant 0 : index
    %c0_21 = arith.constant 0 : index
    %33 = vector.load %arg6[%c0_19, %c0_20, %c0_21] : memref<2x1x96xf32, #tpu.memory_space<vmem>>, vector<1x1x96xf32>
    %34 = vector.shape_cast %33 : vector<1x1x96xf32> to vector<1x96xf32>
    %35 = vector.broadcast %34 : vector<1x96xf32> to vector<8x96xf32>
    %36 = arith.addf %32, %35 : vector<8x96xf32>
    %c0_22 = arith.constant 0 : index
    %c0_23 = arith.constant 0 : index
    %c0_24 = arith.constant 0 : index
    %37 = vector.load %arg7[%c0_22, %c0_23, %c0_24] : memref<2x32x32xf32, #tpu.memory_space<vmem>>, vector<1x32x32xf32>
    %38 = vector.shape_cast %37 : vector<1x32x32xf32> to vector<32x32xf32>
    %cst_25 = arith.constant 0.000000e+00 : f32
    %39 = vector.broadcast %cst_25 : f32 to vector<8x32xf32>
    %40 = vector.extract_strided_slice %36 {offsets = [0, 0], sizes = [8, 8], strides = [1, 1]} : vector<8x96xf32> to vector<8x8xf32>
    %41 = vector.extract_strided_slice %36 {offsets = [0, 32], sizes = [8, 8], strides = [1, 1]} : vector<8x96xf32> to vector<8x8xf32>
    %42 = vector.extract_strided_slice %36 {offsets = [0, 64], sizes = [8, 8], strides = [1, 1]} : vector<8x96xf32> to vector<8x8xf32>
    %cst_26 = arith.constant dense<0.000000e+00> : vector<8x8xf32>
    %43 = tpu.matmul %40, %41, %cst_26 {dimension_numbers = #tpu.dot_dimension_numbers<[1], [1], [0], [0], [0, 0, 1, 0], [], []>} : vector<8x8xf32>, vector<8x8xf32>, vector<8x8xf32> -> vector<8x8xf32>
    %44 = vector.broadcast %29 : vector<1x8xf32> to vector<8x8xf32>
    %45 = arith.addf %43, %44 : vector<8x8xf32>
    %cst_27 = arith.constant dense<0xFF800000> : vector<8xf32>
    %46 = vector.multi_reduction <maximumf>, %45, %cst_27 [1] : vector<8x8xf32> to vector<8xf32>
    %47 = vector.shape_cast %46 : vector<8xf32> to vector<8x1xf32>
    %48 = vector.broadcast %47 : vector<8x1xf32> to vector<8x8xf32>
    %49 = arith.subf %45, %48 : vector<8x8xf32>
    %50 = math.exp %49 : vector<8x8xf32>
    %cst_28 = arith.constant dense<0.000000e+00> : vector<8xf32>
    %51 = vector.multi_reduction <add>, %50, %cst_28 [1] : vector<8x8xf32> to vector<8xf32>
    %52 = vector.shape_cast %51 : vector<8xf32> to vector<8x1xf32>
    %53 = tpu.reciprocal %52 {approx = true} : vector<8x1xf32> -> vector<8x1xf32>
    %54 = vector.broadcast %53 : vector<8x1xf32> to vector<8x8xf32>
    %55 = arith.mulf %50, %54 : vector<8x8xf32>
    %cst_29 = arith.constant dense<0.000000e+00> : vector<8x8xf32>
    %56 = tpu.matmul %55, %42, %cst_29 {dimension_numbers = #tpu.dot_dimension_numbers<[1], [0], [0], [1], [0, 0, 1, 1], [], []>} : vector<8x8xf32>, vector<8x8xf32>, vector<8x8xf32> -> vector<8x8xf32>
    %57 = vector.extract_strided_slice %38 {offsets = [0, 0], sizes = [8, 32], strides = [1, 1]} : vector<32x32xf32> to vector<8x32xf32>
    %cst_30 = arith.constant dense<0.000000e+00> : vector<8x32xf32>
    %58 = tpu.matmul %56, %57, %cst_30 {dimension_numbers = #tpu.dot_dimension_numbers<[1], [0], [0], [1], [0, 0, 1, 1], [], []>} : vector<8x8xf32>, vector<8x32xf32>, vector<8x32xf32> -> vector<8x32xf32>
    %59 = arith.addf %39, %58 : vector<8x32xf32>
    %60 = vector.extract_strided_slice %36 {offsets = [0, 8], sizes = [8, 8], strides = [1, 1]} : vector<8x96xf32> to vector<8x8xf32>
    %61 = vector.extract_strided_slice %36 {offsets = [0, 40], sizes = [8, 8], strides = [1, 1]} : vector<8x96xf32> to vector<8x8xf32>
    %62 = vector.extract_strided_slice %36 {offsets = [0, 72], sizes = [8, 8], strides = [1, 1]} : vector<8x96xf32> to vector<8x8xf32>
    %cst_31 = arith.constant dense<0.000000e+00> : vector<8x8xf32>
    %63 = tpu.matmul %60, %61, %cst_31 {dimension_numbers = #tpu.dot_dimension_numbers<[1], [1], [0], [0], [0, 0, 1, 0], [], []>} : vector<8x8xf32>, vector<8x8xf32>, vector<8x8xf32> -> vector<8x8xf32>
    %64 = vector.broadcast %29 : vector<1x8xf32> to vector<8x8xf32>
    %65 = arith.addf %63, %64 : vector<8x8xf32>
    %cst_32 = arith.constant dense<0xFF800000> : vector<8xf32>
    %66 = vector.multi_reduction <maximumf>, %65, %cst_32 [1] : vector<8x8xf32> to vector<8xf32>
    %67 = vector.shape_cast %66 : vector<8xf32> to vector<8x1xf32>
    %68 = vector.broadcast %67 : vector<8x1xf32> to vector<8x8xf32>
    %69 = arith.subf %65, %68 : vector<8x8xf32>
    %70 = math.exp %69 : vector<8x8xf32>
    %cst_33 = arith.constant dense<0.000000e+00> : vector<8xf32>
    %71 = vector.multi_reduction <add>, %70, %cst_33 [1] : vector<8x8xf32> to vector<8xf32>
    %72 = vector.shape_cast %71 : vector<8xf32> to vector<8x1xf32>
    %73 = tpu.reciprocal %72 {approx = true} : vector<8x1xf32> -> vector<8x1xf32>
    %74 = vector.broadcast %73 : vector<8x1xf32> to vector<8x8xf32>
    %75 = arith.mulf %70, %74 : vector<8x8xf32>
    %cst_34 = arith.constant dense<0.000000e+00> : vector<8x8xf32>
    %76 = tpu.matmul %75, %62, %cst_34 {dimension_numbers = #tpu.dot_dimension_numbers<[1], [0], [0], [1], [0, 0, 1, 1], [], []>} : vector<8x8xf32>, vector<8x8xf32>, vector<8x8xf32> -> vector<8x8xf32>
    %77 = vector.extract_strided_slice %38 {offsets = [8, 0], sizes = [8, 32], strides = [1, 1]} : vector<32x32xf32> to vector<8x32xf32>
    %cst_35 = arith.constant dense<0.000000e+00> : vector<8x32xf32>
    %78 = tpu.matmul %76, %77, %cst_35 {dimension_numbers = #tpu.dot_dimension_numbers<[1], [0], [0], [1], [0, 0, 1, 1], [], []>} : vector<8x8xf32>, vector<8x32xf32>, vector<8x32xf32> -> vector<8x32xf32>
    %79 = arith.addf %59, %78 : vector<8x32xf32>
    %80 = vector.extract_strided_slice %36 {offsets = [0, 16], sizes = [8, 8], strides = [1, 1]} : vector<8x96xf32> to vector<8x8xf32>
    %81 = vector.extract_strided_slice %36 {offsets = [0, 48], sizes = [8, 8], strides = [1, 1]} : vector<8x96xf32> to vector<8x8xf32>
    %82 = vector.extract_strided_slice %36 {offsets = [0, 80], sizes = [8, 8], strides = [1, 1]} : vector<8x96xf32> to vector<8x8xf32>
    %cst_36 = arith.constant dense<0.000000e+00> : vector<8x8xf32>
    %83 = tpu.matmul %80, %81, %cst_36 {dimension_numbers = #tpu.dot_dimension_numbers<[1], [1], [0], [0], [0, 0, 1, 0], [], []>} : vector<8x8xf32>, vector<8x8xf32>, vector<8x8xf32> -> vector<8x8xf32>
    %84 = vector.broadcast %29 : vector<1x8xf32> to vector<8x8xf32>
    %85 = arith.addf %83, %84 : vector<8x8xf32>
    %cst_37 = arith.constant dense<0xFF800000> : vector<8xf32>
    %86 = vector.multi_reduction <maximumf>, %85, %cst_37 [1] : vector<8x8xf32> to vector<8xf32>
    %87 = vector.shape_cast %86 : vector<8xf32> to vector<8x1xf32>
    %88 = vector.broadcast %87 : vector<8x1xf32> to vector<8x8xf32>
    %89 = arith.subf %85, %88 : vector<8x8xf32>
    %90 = math.exp %89 : vector<8x8xf32>
    %cst_38 = arith.constant dense<0.000000e+00> : vector<8xf32>
    %91 = vector.multi_reduction <add>, %90, %cst_38 [1] : vector<8x8xf32> to vector<8xf32>
    %92 = vector.shape_cast %91 : vector<8xf32> to vector<8x1xf32>
    %93 = tpu.reciprocal %92 {approx = true} : vector<8x1xf32> -> vector<8x1xf32>
    %94 = vector.broadcast %93 : vector<8x1xf32> to vector<8x8xf32>
    %95 = arith.mulf %90, %94 : vector<8x8xf32>
    %cst_39 = arith.constant dense<0.000000e+00> : vector<8x8xf32>
    %96 = tpu.matmul %95, %82, %cst_39 {dimension_numbers = #tpu.dot_dimension_numbers<[1], [0], [0], [1], [0, 0, 1, 1], [], []>} : vector<8x8xf32>, vector<8x8xf32>, vector<8x8xf32> -> vector<8x8xf32>
    %97 = vector.extract_strided_slice %38 {offsets = [16, 0], sizes = [8, 32], strides = [1, 1]} : vector<32x32xf32> to vector<8x32xf32>
    %cst_40 = arith.constant dense<0.000000e+00> : vector<8x32xf32>
    %98 = tpu.matmul %96, %97, %cst_40 {dimension_numbers = #tpu.dot_dimension_numbers<[1], [0], [0], [1], [0, 0, 1, 1], [], []>} : vector<8x8xf32>, vector<8x32xf32>, vector<8x32xf32> -> vector<8x32xf32>
    %99 = arith.addf %79, %98 : vector<8x32xf32>
    %100 = vector.extract_strided_slice %36 {offsets = [0, 24], sizes = [8, 8], strides = [1, 1]} : vector<8x96xf32> to vector<8x8xf32>
    %101 = vector.extract_strided_slice %36 {offsets = [0, 56], sizes = [8, 8], strides = [1, 1]} : vector<8x96xf32> to vector<8x8xf32>
    %102 = vector.extract_strided_slice %36 {offsets = [0, 88], sizes = [8, 8], strides = [1, 1]} : vector<8x96xf32> to vector<8x8xf32>
    %cst_41 = arith.constant dense<0.000000e+00> : vector<8x8xf32>
    %103 = tpu.matmul %100, %101, %cst_41 {dimension_numbers = #tpu.dot_dimension_numbers<[1], [1], [0], [0], [0, 0, 1, 0], [], []>} : vector<8x8xf32>, vector<8x8xf32>, vector<8x8xf32> -> vector<8x8xf32>
    %104 = vector.broadcast %29 : vector<1x8xf32> to vector<8x8xf32>
    %105 = arith.addf %103, %104 : vector<8x8xf32>
    %cst_42 = arith.constant dense<0xFF800000> : vector<8xf32>
    %106 = vector.multi_reduction <maximumf>, %105, %cst_42 [1] : vector<8x8xf32> to vector<8xf32>
    %107 = vector.shape_cast %106 : vector<8xf32> to vector<8x1xf32>
    %108 = vector.broadcast %107 : vector<8x1xf32> to vector<8x8xf32>
    %109 = arith.subf %105, %108 : vector<8x8xf32>
    %110 = math.exp %109 : vector<8x8xf32>
    %cst_43 = arith.constant dense<0.000000e+00> : vector<8xf32>
    %111 = vector.multi_reduction <add>, %110, %cst_43 [1] : vector<8x8xf32> to vector<8xf32>
    %112 = vector.shape_cast %111 : vector<8xf32> to vector<8x1xf32>
    %113 = tpu.reciprocal %112 {approx = true} : vector<8x1xf32> -> vector<8x1xf32>
    %114 = vector.broadcast %113 : vector<8x1xf32> to vector<8x8xf32>
    %115 = arith.mulf %110, %114 : vector<8x8xf32>
    %cst_44 = arith.constant dense<0.000000e+00> : vector<8x8xf32>
    %116 = tpu.matmul %115, %102, %cst_44 {dimension_numbers = #tpu.dot_dimension_numbers<[1], [0], [0], [1], [0, 0, 1, 1], [], []>} : vector<8x8xf32>, vector<8x8xf32>, vector<8x8xf32> -> vector<8x8xf32>
    %117 = vector.extract_strided_slice %38 {offsets = [24, 0], sizes = [8, 32], strides = [1, 1]} : vector<32x32xf32> to vector<8x32xf32>
    %cst_45 = arith.constant dense<0.000000e+00> : vector<8x32xf32>
    %118 = tpu.matmul %116, %117, %cst_45 {dimension_numbers = #tpu.dot_dimension_numbers<[1], [0], [0], [1], [0, 0, 1, 1], [], []>} : vector<8x8xf32>, vector<8x32xf32>, vector<8x32xf32> -> vector<8x32xf32>
    %119 = arith.addf %99, %118 : vector<8x32xf32>
    %c0_46 = arith.constant 0 : index
    %c0_47 = arith.constant 0 : index
    %c0_48 = arith.constant 0 : index
    %120 = vector.load %arg8[%c0_46, %c0_47, %c0_48] : memref<2x1x32xf32, #tpu.memory_space<vmem>>, vector<1x1x32xf32>
    %121 = vector.shape_cast %120 : vector<1x1x32xf32> to vector<1x32xf32>
    %122 = vector.broadcast %121 : vector<1x32xf32> to vector<8x32xf32>
    %123 = arith.addf %119, %122 : vector<8x32xf32>
    %124 = arith.addf %123, %23 : vector<8x32xf32>
    %c0_49 = arith.constant 0 : index
    %c0_50 = arith.constant 0 : index
    %c0_51 = arith.constant 0 : index
    %125 = vector.load %arg9[%c0_49, %c0_50, %c0_51] : memref<2x1x32xf32, #tpu.memory_space<vmem>>, vector<1x1x32xf32>
    %126 = vector.shape_cast %125 : vector<1x1x32xf32> to vector<1x32xf32>
    %c0_52 = arith.constant 0 : index
    %c0_53 = arith.constant 0 : index
    %c0_54 = arith.constant 0 : index
    %127 = vector.load %arg10[%c0_52, %c0_53, %c0_54] : memref<2x1x32xf32, #tpu.memory_space<vmem>>, vector<1x1x32xf32>
    %128 = vector.shape_cast %127 : vector<1x1x32xf32> to vector<1x32xf32>
    %cst_55 = arith.constant dense<0.000000e+00> : vector<8xf32>
    %129 = vector.multi_reduction <add>, %124, %cst_55 [1] : vector<8x32xf32> to vector<8xf32>
    %130 = vector.shape_cast %129 : vector<8xf32> to vector<8x1xf32>
    %cst_56 = arith.constant 3.200000e+01 : f32
    %131 = vector.broadcast %cst_56 : f32 to vector<8x1xf32>
    %132 = arith.divf %130, %131 : vector<8x1xf32>
    %133 = vector.broadcast %132 : vector<8x1xf32> to vector<8x32xf32>
    %134 = arith.subf %124, %133 : vector<8x32xf32>
    %135 = arith.mulf %134, %134 : vector<8x32xf32>
    %cst_57 = arith.constant dense<0.000000e+00> : vector<8xf32>
    %136 = vector.multi_reduction <add>, %135, %cst_57 [1] : vector<8x32xf32> to vector<8xf32>
    %137 = vector.shape_cast %136 : vector<8xf32> to vector<8x1xf32>
    %cst_58 = arith.constant 3.200000e+01 : f32
    %138 = vector.broadcast %cst_58 : f32 to vector<8x1xf32>
    %139 = arith.divf %137, %138 : vector<8x1xf32>
    %cst_59 = arith.constant 9.99999996E-13 : f32
    %140 = vector.broadcast %cst_59 : f32 to vector<8x1xf32>
    %141 = arith.addf %139, %140 : vector<8x1xf32>
    %142 = math.rsqrt %141 : vector<8x1xf32>
    %143 = vector.broadcast %142 : vector<8x1xf32> to vector<8x32xf32>
    %144 = arith.mulf %134, %143 : vector<8x32xf32>
    %145 = vector.broadcast %126 : vector<1x32xf32> to vector<8x32xf32>
    %146 = arith.mulf %144, %145 : vector<8x32xf32>
    %147 = vector.broadcast %128 : vector<1x32xf32> to vector<8x32xf32>
    %148 = arith.addf %146, %147 : vector<8x32xf32>
    %c0_60 = arith.constant 0 : index
    %c0_61 = arith.constant 0 : index
    %c0_62 = arith.constant 0 : index
    %149 = vector.load %arg11[%c0_60, %c0_61, %c0_62] : memref<2x32x64xf32, #tpu.memory_space<vmem>>, vector<1x32x64xf32>
    %150 = vector.shape_cast %149 : vector<1x32x64xf32> to vector<32x64xf32>
    %cst_63 = arith.constant dense<0.000000e+00> : vector<8x64xf32>
    %151 = tpu.matmul %148, %150, %cst_63 {dimension_numbers = #tpu.dot_dimension_numbers<[1], [0], [0], [1], [0, 0, 1, 1], [], []>} : vector<8x32xf32>, vector<32x64xf32>, vector<8x64xf32> -> vector<8x64xf32>
    %c0_64 = arith.constant 0 : index
    %c0_65 = arith.constant 0 : index
    %c0_66 = arith.constant 0 : index
    %152 = vector.load %arg12[%c0_64, %c0_65, %c0_66] : memref<2x1x64xf32, #tpu.memory_space<vmem>>, vector<1x1x64xf32>
    %153 = vector.shape_cast %152 : vector<1x1x64xf32> to vector<1x64xf32>
    %154 = vector.broadcast %153 : vector<1x64xf32> to vector<8x64xf32>
    %155 = arith.addf %151, %154 : vector<8x64xf32>
    %156 = arith.mulf %155, %155 : vector<8x64xf32>
    %157 = arith.mulf %155, %156 : vector<8x64xf32>
    %cst_67 = arith.constant 4.471500e-02 : f32
    %158 = vector.broadcast %cst_67 : f32 to vector<8x64xf32>
    %159 = arith.mulf %158, %157 : vector<8x64xf32>
    %160 = arith.addf %155, %159 : vector<8x64xf32>
    %cst_68 = arith.constant 0.797884583 : f32
    %161 = vector.broadcast %cst_68 : f32 to vector<8x64xf32>
    %162 = arith.mulf %161, %160 : vector<8x64xf32>
    %163 = math.tanh %162 : vector<8x64xf32>
    %cst_69 = arith.constant 1.000000e+00 : f32
    %164 = vector.broadcast %cst_69 : f32 to vector<8x64xf32>
    %165 = arith.addf %164, %163 : vector<8x64xf32>
    %cst_70 = arith.constant 5.000000e-01 : f32
    %166 = vector.broadcast %cst_70 : f32 to vector<8x64xf32>
    %167 = arith.mulf %166, %165 : vector<8x64xf32>
    %168 = arith.mulf %155, %167 : vector<8x64xf32>
    %c0_71 = arith.constant 0 : index
    %c0_72 = arith.constant 0 : index
    %c0_73 = arith.constant 0 : index
    %169 = vector.load %arg13[%c0_71, %c0_72, %c0_73] : memref<2x64x32xf32, #tpu.memory_space<vmem>>, vector<1x64x32xf32>
    %170 = vector.shape_cast %169 : vector<1x64x32xf32> to vector<64x32xf32>
    %cst_74 = arith.constant dense<0.000000e+00> : vector<8x32xf32>
    %171 = tpu.matmul %168, %170, %cst_74 {dimension_numbers = #tpu.dot_dimension_numbers<[1], [0], [0], [1], [0, 0, 1, 1], [], []>} : vector<8x64xf32>, vector<64x32xf32>, vector<8x32xf32> -> vector<8x32xf32>
    %c0_75 = arith.constant 0 : index
    %c0_76 = arith.constant 0 : index
    %c0_77 = arith.constant 0 : index
    %172 = vector.load %arg14[%c0_75, %c0_76, %c0_77] : memref<2x1x32xf32, #tpu.memory_space<vmem>>, vector<1x1x32xf32>
    %173 = vector.shape_cast %172 : vector<1x1x32xf32> to vector<1x32xf32>
    %174 = vector.broadcast %173 : vector<1x32xf32> to vector<8x32xf32>
    %175 = arith.addf %171, %174 : vector<8x32xf32>
    %176 = arith.addf %175, %148 : vector<8x32xf32>
    %c0_78 = arith.constant 0 : index
    %c0_79 = arith.constant 0 : index
    %c0_80 = arith.constant 0 : index
    %177 = vector.load %arg15[%c0_78, %c0_79, %c0_80] : memref<2x1x32xf32, #tpu.memory_space<vmem>>, vector<1x1x32xf32>
    %178 = vector.shape_cast %177 : vector<1x1x32xf32> to vector<1x32xf32>
    %c0_81 = arith.constant 0 : index
    %c0_82 = arith.constant 0 : index
    %c0_83 = arith.constant 0 : index
    %179 = vector.load %arg16[%c0_81, %c0_82, %c0_83] : memref<2x1x32xf32, #tpu.memory_space<vmem>>, vector<1x1x32xf32>
    %180 = vector.shape_cast %179 : vector<1x1x32xf32> to vector<1x32xf32>
    %cst_84 = arith.constant dense<0.000000e+00> : vector<8xf32>
    %181 = vector.multi_reduction <add>, %176, %cst_84 [1] : vector<8x32xf32> to vector<8xf32>
    %182 = vector.shape_cast %181 : vector<8xf32> to vector<8x1xf32>
    %cst_85 = arith.constant 3.200000e+01 : f32
    %183 = vector.broadcast %cst_85 : f32 to vector<8x1xf32>
    %184 = arith.divf %182, %183 : vector<8x1xf32>
    %185 = vector.broadcast %184 : vector<8x1xf32> to vector<8x32xf32>
    %186 = arith.subf %176, %185 : vector<8x32xf32>
    %187 = arith.mulf %186, %186 : vector<8x32xf32>
    %cst_86 = arith.constant dense<0.000000e+00> : vector<8xf32>
    %188 = vector.multi_reduction <add>, %187, %cst_86 [1] : vector<8x32xf32> to vector<8xf32>
    %189 = vector.shape_cast %188 : vector<8xf32> to vector<8x1xf32>
    %cst_87 = arith.constant 3.200000e+01 : f32
    %190 = vector.broadcast %cst_87 : f32 to vector<8x1xf32>
    %191 = arith.divf %189, %190 : vector<8x1xf32>
    %cst_88 = arith.constant 9.99999996E-13 : f32
    %192 = vector.broadcast %cst_88 : f32 to vector<8x1xf32>
    %193 = arith.addf %191, %192 : vector<8x1xf32>
    %194 = math.rsqrt %193 : vector<8x1xf32>
    %195 = vector.broadcast %194 : vector<8x1xf32> to vector<8x32xf32>
    %196 = arith.mulf %186, %195 : vector<8x32xf32>
    %197 = vector.broadcast %178 : vector<1x32xf32> to vector<8x32xf32>
    %198 = arith.mulf %196, %197 : vector<8x32xf32>
    %199 = vector.broadcast %180 : vector<1x32xf32> to vector<8x32xf32>
    %200 = arith.addf %198, %199 : vector<8x32xf32>
    %c1 = arith.constant 1 : index
    %c0_89 = arith.constant 0 : index
    %c0_90 = arith.constant 0 : index
    %201 = vector.load %arg5[%c1, %c0_89, %c0_90] : memref<2x32x96xf32, #tpu.memory_space<vmem>>, vector<1x32x96xf32>
    %202 = vector.shape_cast %201 : vector<1x32x96xf32> to vector<32x96xf32>
    %cst_91 = arith.constant dense<0.000000e+00> : vector<8x96xf32>
    %203 = tpu.matmul %200, %202, %cst_91 {dimension_numbers = #tpu.dot_dimension_numbers<[1], [0], [0], [1], [0, 0, 1, 1], [], []>} : vector<8x32xf32>, vector<32x96xf32>, vector<8x96xf32> -> vector<8x96xf32>
    %c1_92 = arith.constant 1 : index
    %c0_93 = arith.constant 0 : index
    %c0_94 = arith.constant 0 : index
    %204 = vector.load %arg6[%c1_92, %c0_93, %c0_94] : memref<2x1x96xf32, #tpu.memory_space<vmem>>, vector<1x1x96xf32>
    %205 = vector.shape_cast %204 : vector<1x1x96xf32> to vector<1x96xf32>
    %206 = vector.broadcast %205 : vector<1x96xf32> to vector<8x96xf32>
    %207 = arith.addf %203, %206 : vector<8x96xf32>
    %c1_95 = arith.constant 1 : index
    %c0_96 = arith.constant 0 : index
    %c0_97 = arith.constant 0 : index
    %208 = vector.load %arg7[%c1_95, %c0_96, %c0_97] : memref<2x32x32xf32, #tpu.memory_space<vmem>>, vector<1x32x32xf32>
    %209 = vector.shape_cast %208 : vector<1x32x32xf32> to vector<32x32xf32>
    %cst_98 = arith.constant 0.000000e+00 : f32
    %210 = vector.broadcast %cst_98 : f32 to vector<8x32xf32>
    %211 = vector.extract_strided_slice %207 {offsets = [0, 0], sizes = [8, 8], strides = [1, 1]} : vector<8x96xf32> to vector<8x8xf32>
    %212 = vector.extract_strided_slice %207 {offsets = [0, 32], sizes = [8, 8], strides = [1, 1]} : vector<8x96xf32> to vector<8x8xf32>
    %213 = vector.extract_strided_slice %207 {offsets = [0, 64], sizes = [8, 8], strides = [1, 1]} : vector<8x96xf32> to vector<8x8xf32>
    %cst_99 = arith.constant dense<0.000000e+00> : vector<8x8xf32>
    %214 = tpu.matmul %211, %212, %cst_99 {dimension_numbers = #tpu.dot_dimension_numbers<[1], [1], [0], [0], [0, 0, 1, 0], [], []>} : vector<8x8xf32>, vector<8x8xf32>, vector<8x8xf32> -> vector<8x8xf32>
    %215 = vector.broadcast %29 : vector<1x8xf32> to vector<8x8xf32>
    %216 = arith.addf %214, %215 : vector<8x8xf32>
    %cst_100 = arith.constant dense<0xFF800000> : vector<8xf32>
    %217 = vector.multi_reduction <maximumf>, %216, %cst_100 [1] : vector<8x8xf32> to vector<8xf32>
    %218 = vector.shape_cast %217 : vector<8xf32> to vector<8x1xf32>
    %219 = vector.broadcast %218 : vector<8x1xf32> to vector<8x8xf32>
    %220 = arith.subf %216, %219 : vector<8x8xf32>
    %221 = math.exp %220 : vector<8x8xf32>
    %cst_101 = arith.constant dense<0.000000e+00> : vector<8xf32>
    %222 = vector.multi_reduction <add>, %221, %cst_101 [1] : vector<8x8xf32> to vector<8xf32>
    %223 = vector.shape_cast %222 : vector<8xf32> to vector<8x1xf32>
    %224 = tpu.reciprocal %223 {approx = true} : vector<8x1xf32> -> vector<8x1xf32>
    %225 = vector.broadcast %224 : vector<8x1xf32> to vector<8x8xf32>
    %226 = arith.mulf %221, %225 : vector<8x8xf32>
    %cst_102 = arith.constant dense<0.000000e+00> : vector<8x8xf32>
    %227 = tpu.matmul %226, %213, %cst_102 {dimension_numbers = #tpu.dot_dimension_numbers<[1], [0], [0], [1], [0, 0, 1, 1], [], []>} : vector<8x8xf32>, vector<8x8xf32>, vector<8x8xf32> -> vector<8x8xf32>
    %228 = vector.extract_strided_slice %209 {offsets = [0, 0], sizes = [8, 32], strides = [1, 1]} : vector<32x32xf32> to vector<8x32xf32>
    %cst_103 = arith.constant dense<0.000000e+00> : vector<8x32xf32>
    %229 = tpu.matmul %227, %228, %cst_103 {dimension_numbers = #tpu.dot_dimension_numbers<[1], [0], [0], [1], [0, 0, 1, 1], [], []>} : vector<8x8xf32>, vector<8x32xf32>, vector<8x32xf32> -> vector<8x32xf32>
    %230 = arith.addf %210, %229 : vector<8x32xf32>
    %231 = vector.extract_strided_slice %207 {offsets = [0, 8], sizes = [8, 8], strides = [1, 1]} : vector<8x96xf32> to vector<8x8xf32>
    %232 = vector.extract_strided_slice %207 {offsets = [0, 40], sizes = [8, 8], strides = [1, 1]} : vector<8x96xf32> to vector<8x8xf32>
    %233 = vector.extract_strided_slice %207 {offsets = [0, 72], sizes = [8, 8], strides = [1, 1]} : vector<8x96xf32> to vector<8x8xf32>
    %cst_104 = arith.constant dense<0.000000e+00> : vector<8x8xf32>
    %234 = tpu.matmul %231, %232, %cst_104 {dimension_numbers = #tpu.dot_dimension_numbers<[1], [1], [0], [0], [0, 0, 1, 0], [], []>} : vector<8x8xf32>, vector<8x8xf32>, vector<8x8xf32> -> vector<8x8xf32>
    %235 = vector.broadcast %29 : vector<1x8xf32> to vector<8x8xf32>
    %236 = arith.addf %234, %235 : vector<8x8xf32>
    %cst_105 = arith.constant dense<0xFF800000> : vector<8xf32>
    %237 = vector.multi_reduction <maximumf>, %236, %cst_105 [1] : vector<8x8xf32> to vector<8xf32>
    %238 = vector.shape_cast %237 : vector<8xf32> to vector<8x1xf32>
    %239 = vector.broadcast %238 : vector<8x1xf32> to vector<8x8xf32>
    %240 = arith.subf %236, %239 : vector<8x8xf32>
    %241 = math.exp %240 : vector<8x8xf32>
    %cst_106 = arith.constant dense<0.000000e+00> : vector<8xf32>
    %242 = vector.multi_reduction <add>, %241, %cst_106 [1] : vector<8x8xf32> to vector<8xf32>
    %243 = vector.shape_cast %242 : vector<8xf32> to vector<8x1xf32>
    %244 = tpu.reciprocal %243 {approx = true} : vector<8x1xf32> -> vector<8x1xf32>
    %245 = vector.broadcast %244 : vector<8x1xf32> to vector<8x8xf32>
    %246 = arith.mulf %241, %245 : vector<8x8xf32>
    %cst_107 = arith.constant dense<0.000000e+00> : vector<8x8xf32>
    %247 = tpu.matmul %246, %233, %cst_107 {dimension_numbers = #tpu.dot_dimension_numbers<[1], [0], [0], [1], [0, 0, 1, 1], [], []>} : vector<8x8xf32>, vector<8x8xf32>, vector<8x8xf32> -> vector<8x8xf32>
    %248 = vector.extract_strided_slice %209 {offsets = [8, 0], sizes = [8, 32], strides = [1, 1]} : vector<32x32xf32> to vector<8x32xf32>
    %cst_108 = arith.constant dense<0.000000e+00> : vector<8x32xf32>
    %249 = tpu.matmul %247, %248, %cst_108 {dimension_numbers = #tpu.dot_dimension_numbers<[1], [0], [0], [1], [0, 0, 1, 1], [], []>} : vector<8x8xf32>, vector<8x32xf32>, vector<8x32xf32> -> vector<8x32xf32>
    %250 = arith.addf %230, %249 : vector<8x32xf32>
    %251 = vector.extract_strided_slice %207 {offsets = [0, 16], sizes = [8, 8], strides = [1, 1]} : vector<8x96xf32> to vector<8x8xf32>
    %252 = vector.extract_strided_slice %207 {offsets = [0, 48], sizes = [8, 8], strides = [1, 1]} : vector<8x96xf32> to vector<8x8xf32>
    %253 = vector.extract_strided_slice %207 {offsets = [0, 80], sizes = [8, 8], strides = [1, 1]} : vector<8x96xf32> to vector<8x8xf32>
    %cst_109 = arith.constant dense<0.000000e+00> : vector<8x8xf32>
    %254 = tpu.matmul %251, %252, %cst_109 {dimension_numbers = #tpu.dot_dimension_numbers<[1], [1], [0], [0], [0, 0, 1, 0], [], []>} : vector<8x8xf32>, vector<8x8xf32>, vector<8x8xf32> -> vector<8x8xf32>
    %255 = vector.broadcast %29 : vector<1x8xf32> to vector<8x8xf32>
    %256 = arith.addf %254, %255 : vector<8x8xf32>
    %cst_110 = arith.constant dense<0xFF800000> : vector<8xf32>
    %257 = vector.multi_reduction <maximumf>, %256, %cst_110 [1] : vector<8x8xf32> to vector<8xf32>
    %258 = vector.shape_cast %257 : vector<8xf32> to vector<8x1xf32>
    %259 = vector.broadcast %258 : vector<8x1xf32> to vector<8x8xf32>
    %260 = arith.subf %256, %259 : vector<8x8xf32>
    %261 = math.exp %260 : vector<8x8xf32>
    %cst_111 = arith.constant dense<0.000000e+00> : vector<8xf32>
    %262 = vector.multi_reduction <add>, %261, %cst_111 [1] : vector<8x8xf32> to vector<8xf32>
    %263 = vector.shape_cast %262 : vector<8xf32> to vector<8x1xf32>
    %264 = tpu.reciprocal %263 {approx = true} : vector<8x1xf32> -> vector<8x1xf32>
    %265 = vector.broadcast %264 : vector<8x1xf32> to vector<8x8xf32>
    %266 = arith.mulf %261, %265 : vector<8x8xf32>
    %cst_112 = arith.constant dense<0.000000e+00> : vector<8x8xf32>
    %267 = tpu.matmul %266, %253, %cst_112 {dimension_numbers = #tpu.dot_dimension_numbers<[1], [0], [0], [1], [0, 0, 1, 1], [], []>} : vector<8x8xf32>, vector<8x8xf32>, vector<8x8xf32> -> vector<8x8xf32>
    %268 = vector.extract_strided_slice %209 {offsets = [16, 0], sizes = [8, 32], strides = [1, 1]} : vector<32x32xf32> to vector<8x32xf32>
    %cst_113 = arith.constant dense<0.000000e+00> : vector<8x32xf32>
    %269 = tpu.matmul %267, %268, %cst_113 {dimension_numbers = #tpu.dot_dimension_numbers<[1], [0], [0], [1], [0, 0, 1, 1], [], []>} : vector<8x8xf32>, vector<8x32xf32>, vector<8x32xf32> -> vector<8x32xf32>
    %270 = arith.addf %250, %269 : vector<8x32xf32>
    %271 = vector.extract_strided_slice %207 {offsets = [0, 24], sizes = [8, 8], strides = [1, 1]} : vector<8x96xf32> to vector<8x8xf32>
    %272 = vector.extract_strided_slice %207 {offsets = [0, 56], sizes = [8, 8], strides = [1, 1]} : vector<8x96xf32> to vector<8x8xf32>
    %273 = vector.extract_strided_slice %207 {offsets = [0, 88], sizes = [8, 8], strides = [1, 1]} : vector<8x96xf32> to vector<8x8xf32>
    %cst_114 = arith.constant dense<0.000000e+00> : vector<8x8xf32>
    %274 = tpu.matmul %271, %272, %cst_114 {dimension_numbers = #tpu.dot_dimension_numbers<[1], [1], [0], [0], [0, 0, 1, 0], [], []>} : vector<8x8xf32>, vector<8x8xf32>, vector<8x8xf32> -> vector<8x8xf32>
    %275 = vector.broadcast %29 : vector<1x8xf32> to vector<8x8xf32>
    %276 = arith.addf %274, %275 : vector<8x8xf32>
    %cst_115 = arith.constant dense<0xFF800000> : vector<8xf32>
    %277 = vector.multi_reduction <maximumf>, %276, %cst_115 [1] : vector<8x8xf32> to vector<8xf32>
    %278 = vector.shape_cast %277 : vector<8xf32> to vector<8x1xf32>
    %279 = vector.broadcast %278 : vector<8x1xf32> to vector<8x8xf32>
    %280 = arith.subf %276, %279 : vector<8x8xf32>
    %281 = math.exp %280 : vector<8x8xf32>
    %cst_116 = arith.constant dense<0.000000e+00> : vector<8xf32>
    %282 = vector.multi_reduction <add>, %281, %cst_116 [1] : vector<8x8xf32> to vector<8xf32>
    %283 = vector.shape_cast %282 : vector<8xf32> to vector<8x1xf32>
    %284 = tpu.reciprocal %283 {approx = true} : vector<8x1xf32> -> vector<8x1xf32>
    %285 = vector.broadcast %284 : vector<8x1xf32> to vector<8x8xf32>
    %286 = arith.mulf %281, %285 : vector<8x8xf32>
    %cst_117 = arith.constant dense<0.000000e+00> : vector<8x8xf32>
    %287 = tpu.matmul %286, %273, %cst_117 {dimension_numbers = #tpu.dot_dimension_numbers<[1], [0], [0], [1], [0, 0, 1, 1], [], []>} : vector<8x8xf32>, vector<8x8xf32>, vector<8x8xf32> -> vector<8x8xf32>
    %288 = vector.extract_strided_slice %209 {offsets = [24, 0], sizes = [8, 32], strides = [1, 1]} : vector<32x32xf32> to vector<8x32xf32>
    %cst_118 = arith.constant dense<0.000000e+00> : vector<8x32xf32>
    %289 = tpu.matmul %287, %288, %cst_118 {dimension_numbers = #tpu.dot_dimension_numbers<[1], [0], [0], [1], [0, 0, 1, 1], [], []>} : vector<8x8xf32>, vector<8x32xf32>, vector<8x32xf32> -> vector<8x32xf32>
    %290 = arith.addf %270, %289 : vector<8x32xf32>
    %c1_119 = arith.constant 1 : index
    %c0_120 = arith.constant 0 : index
    %c0_121 = arith.constant 0 : index
    %291 = vector.load %arg8[%c1_119, %c0_120, %c0_121] : memref<2x1x32xf32, #tpu.memory_space<vmem>>, vector<1x1x32xf32>
    %292 = vector.shape_cast %291 : vector<1x1x32xf32> to vector<1x32xf32>
    %293 = vector.broadcast %292 : vector<1x32xf32> to vector<8x32xf32>
    %294 = arith.addf %290, %293 : vector<8x32xf32>
    %295 = arith.addf %294, %200 : vector<8x32xf32>
    %c1_122 = arith.constant 1 : index
    %c0_123 = arith.constant 0 : index
    %c0_124 = arith.constant 0 : index
    %296 = vector.load %arg9[%c1_122, %c0_123, %c0_124] : memref<2x1x32xf32, #tpu.memory_space<vmem>>, vector<1x1x32xf32>
    %297 = vector.shape_cast %296 : vector<1x1x32xf32> to vector<1x32xf32>
    %c1_125 = arith.constant 1 : index
    %c0_126 = arith.constant 0 : index
    %c0_127 = arith.constant 0 : index
    %298 = vector.load %arg10[%c1_125, %c0_126, %c0_127] : memref<2x1x32xf32, #tpu.memory_space<vmem>>, vector<1x1x32xf32>
    %299 = vector.shape_cast %298 : vector<1x1x32xf32> to vector<1x32xf32>
    %cst_128 = arith.constant dense<0.000000e+00> : vector<8xf32>
    %300 = vector.multi_reduction <add>, %295, %cst_128 [1] : vector<8x32xf32> to vector<8xf32>
    %301 = vector.shape_cast %300 : vector<8xf32> to vector<8x1xf32>
    %cst_129 = arith.constant 3.200000e+01 : f32
    %302 = vector.broadcast %cst_129 : f32 to vector<8x1xf32>
    %303 = arith.divf %301, %302 : vector<8x1xf32>
    %304 = vector.broadcast %303 : vector<8x1xf32> to vector<8x32xf32>
    %305 = arith.subf %295, %304 : vector<8x32xf32>
    %306 = arith.mulf %305, %305 : vector<8x32xf32>
    %cst_130 = arith.constant dense<0.000000e+00> : vector<8xf32>
    %307 = vector.multi_reduction <add>, %306, %cst_130 [1] : vector<8x32xf32> to vector<8xf32>
    %308 = vector.shape_cast %307 : vector<8xf32> to vector<8x1xf32>
    %cst_131 = arith.constant 3.200000e+01 : f32
    %309 = vector.broadcast %cst_131 : f32 to vector<8x1xf32>
    %310 = arith.divf %308, %309 : vector<8x1xf32>
    %cst_132 = arith.constant 9.99999996E-13 : f32
    %311 = vector.broadcast %cst_132 : f32 to vector<8x1xf32>
    %312 = arith.addf %310, %311 : vector<8x1xf32>
    %313 = math.rsqrt %312 : vector<8x1xf32>
    %314 = vector.broadcast %313 : vector<8x1xf32> to vector<8x32xf32>
    %315 = arith.mulf %305, %314 : vector<8x32xf32>
    %316 = vector.broadcast %297 : vector<1x32xf32> to vector<8x32xf32>
    %317 = arith.mulf %315, %316 : vector<8x32xf32>
    %318 = vector.broadcast %299 : vector<1x32xf32> to vector<8x32xf32>
    %319 = arith.addf %317, %318 : vector<8x32xf32>
    %c1_133 = arith.constant 1 : index
    %c0_134 = arith.constant 0 : index
    %c0_135 = arith.constant 0 : index
    %320 = vector.load %arg11[%c1_133, %c0_134, %c0_135] : memref<2x32x64xf32, #tpu.memory_space<vmem>>, vector<1x32x64xf32>
    %321 = vector.shape_cast %320 : vector<1x32x64xf32> to vector<32x64xf32>
    %cst_136 = arith.constant dense<0.000000e+00> : vector<8x64xf32>
    %322 = tpu.matmul %319, %321, %cst_136 {dimension_numbers = #tpu.dot_dimension_numbers<[1], [0], [0], [1], [0, 0, 1, 1], [], []>} : vector<8x32xf32>, vector<32x64xf32>, vector<8x64xf32> -> vector<8x64xf32>
    %c1_137 = arith.constant 1 : index
    %c0_138 = arith.constant 0 : index
    %c0_139 = arith.constant 0 : index
    %323 = vector.load %arg12[%c1_137, %c0_138, %c0_139] : memref<2x1x64xf32, #tpu.memory_space<vmem>>, vector<1x1x64xf32>
    %324 = vector.shape_cast %323 : vector<1x1x64xf32> to vector<1x64xf32>
    %325 = vector.broadcast %324 : vector<1x64xf32> to vector<8x64xf32>
    %326 = arith.addf %322, %325 : vector<8x64xf32>
    %327 = arith.mulf %326, %326 : vector<8x64xf32>
    %328 = arith.mulf %326, %327 : vector<8x64xf32>
    %cst_140 = arith.constant 4.471500e-02 : f32
    %329 = vector.broadcast %cst_140 : f32 to vector<8x64xf32>
    %330 = arith.mulf %329, %328 : vector<8x64xf32>
    %331 = arith.addf %326, %330 : vector<8x64xf32>
    %cst_141 = arith.constant 0.797884583 : f32
    %332 = vector.broadcast %cst_141 : f32 to vector<8x64xf32>
    %333 = arith.mulf %332, %331 : vector<8x64xf32>
    %334 = math.tanh %333 : vector<8x64xf32>
    %cst_142 = arith.constant 1.000000e+00 : f32
    %335 = vector.broadcast %cst_142 : f32 to vector<8x64xf32>
    %336 = arith.addf %335, %334 : vector<8x64xf32>
    %cst_143 = arith.constant 5.000000e-01 : f32
    %337 = vector.broadcast %cst_143 : f32 to vector<8x64xf32>
    %338 = arith.mulf %337, %336 : vector<8x64xf32>
    %339 = arith.mulf %326, %338 : vector<8x64xf32>
    %c1_144 = arith.constant 1 : index
    %c0_145 = arith.constant 0 : index
    %c0_146 = arith.constant 0 : index
    %340 = vector.load %arg13[%c1_144, %c0_145, %c0_146] : memref<2x64x32xf32, #tpu.memory_space<vmem>>, vector<1x64x32xf32>
    %341 = vector.shape_cast %340 : vector<1x64x32xf32> to vector<64x32xf32>
    %cst_147 = arith.constant dense<0.000000e+00> : vector<8x32xf32>
    %342 = tpu.matmul %339, %341, %cst_147 {dimension_numbers = #tpu.dot_dimension_numbers<[1], [0], [0], [1], [0, 0, 1, 1], [], []>} : vector<8x64xf32>, vector<64x32xf32>, vector<8x32xf32> -> vector<8x32xf32>
    %c1_148 = arith.constant 1 : index
    %c0_149 = arith.constant 0 : index
    %c0_150 = arith.constant 0 : index
    %343 = vector.load %arg14[%c1_148, %c0_149, %c0_150] : memref<2x1x32xf32, #tpu.memory_space<vmem>>, vector<1x1x32xf32>
    %344 = vector.shape_cast %343 : vector<1x1x32xf32> to vector<1x32xf32>
    %345 = vector.broadcast %344 : vector<1x32xf32> to vector<8x32xf32>
    %346 = arith.addf %342, %345 : vector<8x32xf32>
    %347 = arith.addf %346, %319 : vector<8x32xf32>
    %c1_151 = arith.constant 1 : index
    %c0_152 = arith.constant 0 : index
    %c0_153 = arith.constant 0 : index
    %348 = vector.load %arg15[%c1_151, %c0_152, %c0_153] : memref<2x1x32xf32, #tpu.memory_space<vmem>>, vector<1x1x32xf32>
    %349 = vector.shape_cast %348 : vector<1x1x32xf32> to vector<1x32xf32>
    %c1_154 = arith.constant 1 : index
    %c0_155 = arith.constant 0 : index
    %c0_156 = arith.constant 0 : index
    %350 = vector.load %arg16[%c1_154, %c0_155, %c0_156] : memref<2x1x32xf32, #tpu.memory_space<vmem>>, vector<1x1x32xf32>
    %351 = vector.shape_cast %350 : vector<1x1x32xf32> to vector<1x32xf32>
    %cst_157 = arith.constant dense<0.000000e+00> : vector<8xf32>
    %352 = vector.multi_reduction <add>, %347, %cst_157 [1] : vector<8x32xf32> to vector<8xf32>
    %353 = vector.shape_cast %352 : vector<8xf32> to vector<8x1xf32>
    %cst_158 = arith.constant 3.200000e+01 : f32
    %354 = vector.broadcast %cst_158 : f32 to vector<8x1xf32>
    %355 = arith.divf %353, %354 : vector<8x1xf32>
    %356 = vector.broadcast %355 : vector<8x1xf32> to vector<8x32xf32>
    %357 = arith.subf %347, %356 : vector<8x32xf32>
    %358 = arith.mulf %357, %357 : vector<8x32xf32>
    %cst_159 = arith.constant dense<0.000000e+00> : vector<8xf32>
    %359 = vector.multi_reduction <add>, %358, %cst_159 [1] : vector<8x32xf32> to vector<8xf32>
    %360 = vector.shape_cast %359 : vector<8xf32> to vector<8x1xf32>
    %cst_160 = arith.constant 3.200000e+01 : f32
    %361 = vector.broadcast %cst_160 : f32 to vector<8x1xf32>
    %362 = arith.divf %360, %361 : vector<8x1xf32>
    %cst_161 = arith.constant 9.99999996E-13 : f32
    %363 = vector.broadcast %cst_161 : f32 to vector<8x1xf32>
    %364 = arith.addf %362, %363 : vector<8x1xf32>
    %365 = math.rsqrt %364 : vector<8x1xf32>
    %366 = vector.broadcast %365 : vector<8x1xf32> to vector<8x32xf32>
    %367 = arith.mulf %357, %366 : vector<8x32xf32>
    %368 = vector.broadcast %349 : vector<1x32xf32> to vector<8x32xf32>
    %369 = arith.mulf %367, %368 : vector<8x32xf32>
    %370 = vector.broadcast %351 : vector<1x32xf32> to vector<8x32xf32>
    %371 = arith.addf %369, %370 : vector<8x32xf32>
    %cst_162 = arith.constant dense<0.000000e+00> : vector<32xf32>
    %372 = vector.multi_reduction <add>, %371, %cst_162 [0] : vector<8x32xf32> to vector<32xf32>
    %373 = vector.shape_cast %372 : vector<32xf32> to vector<1x32xf32>
    %cst_163 = arith.constant 8.000000e+00 : f32
    %374 = vector.broadcast %cst_163 : f32 to vector<1x32xf32>
    %375 = arith.divf %373, %374 : vector<1x32xf32>
    %c0_164 = arith.constant 0 : index
    %c0_165 = arith.constant 0 : index
    %c0_166 = arith.constant 0 : index
    %376 = vector.load %arg17[%c0_164, %c0_165, %c0_166] : memref<1x1x32xf32, #tpu.memory_space<vmem>>, vector<1x1x32xf32>
    %377 = vector.shape_cast %376 : vector<1x1x32xf32> to vector<1x32xf32>
    %378 = vector.shape_cast %375 : vector<1x32xf32> to vector<1x1x32xf32>
    tpu.vector_store %arg17[%c0_164, %c0_165, %c0_166], %378 {strides = array<i32>} : memref<1x1x32xf32, #tpu.memory_space<vmem>>, vector<1x1x32xf32>,
    return
  }
  func.func @transform_0(%arg0: i32) -> (i32, i32, i32) {
    %c0_i32 = arith.constant 0 : i32
    %c0_i32_0 = arith.constant 0 : i32
    %c0_i32_1 = arith.constant 0 : i32
    return %arg0, %c0_i32, %c0_i32_0 : i32, i32, i32
  }
  func.func @transform_1(%arg0: i32) -> (i32, i32, i32) {
    %c0_i32 = arith.constant 0 : i32
    %c0_i32_0 = arith.constant 0 : i32
    %c0_i32_1 = arith.constant 0 : i32
    return %arg0, %c0_i32, %c0_i32_0 : i32, i32, i32
  }
  func.func @transform_2(%arg0: i32) -> (i32, i32) {
    %c0_i32 = arith.constant 0 : i32
    %c0_i32_0 = arith.constant 0 : i32
    %c0_i32_1 = arith.constant 0 : i32
    return %c0_i32, %c0_i32_0 : i32, i32
  }
  func.func @transform_3(%arg0: i32) -> (i32, i32) {
    %c0_i32 = arith.constant 0 : i32
    %c0_i32_0 = arith.constant 0 : i32
    %c0_i32_1 = arith.constant 0 : i32
    return %c0_i32, %c0_i32_0 : i32, i32
  }
  func.func @transform_4(%arg0: i32) -> (i32, i32, i32) {
    %c0_i32 = arith.constant 0 : i32
    %c0_i32_0 = arith.constant 0 : i32
    %c0_i32_1 = arith.constant 0 : i32
    %c0_i32_2 = arith.constant 0 : i32
    return %c0_i32, %c0_i32_0, %c0_i32_1 : i32, i32, i32
  }
  func.func @transform_5(%arg0: i32) -> (i32, i32, i32) {
    %c0_i32 = arith.constant 0 : i32
    %c0_i32_0 = arith.constant 0 : i32
    %c0_i32_1 = arith.constant 0 : i32
    %c0_i32_2 = arith.constant 0 : i32
    return %c0_i32, %c0_i32_0, %c0_i32_1 : i32, i32, i32
  }
  func.func @transform_6(%arg0: i32) -> (i32, i32, i32) {
    %c0_i32 = arith.constant 0 : i32
    %c0_i32_0 = arith.constant 0 : i32
    %c0_i32_1 = arith.constant 0 : i32
    %c0_i32_2 = arith.constant 0 : i32
    return %c0_i32, %c0_i32_0, %c0_i32_1 : i32, i32, i32
  }
  func.func @transform_7(%arg0: i32) -> (i32, i32, i32) {
    %c0_i32 = arith.constant 0 : i32
    %c0_i32_0 = arith.constant 0 : i32
    %c0_i32_1 = arith.constant 0 : i32
    %c0_i32_2 = arith.constant 0 : i32
    return %c0_i32, %c0_i32_0, %c0_i32_1 : i32, i32, i32
  }
  func.func @transform_8(%arg0: i32) -> (i32, i32, i32) {
    %c0_i32 = arith.constant 0 : i32
    %c0_i32_0 = arith.constant 0 : i32
    %c0_i32_1 = arith.constant 0 : i32
    %c0_i32_2 = arith.constant 0 : i32
    return %c0_i32, %c0_i32_0, %c0_i32_1 : i32, i32, i32
  }
  func.func @transform_9(%arg0: i32) -> (i32, i32, i32) {
    %c0_i32 = arith.constant 0 : i32
    %c0_i32_0 = arith.constant 0 : i32
    %c0_i32_1 = arith.constant 0 : i32
    %c0_i32_2 = arith.constant 0 : i32
    return %c0_i32, %c0_i32_0, %c0_i32_1 : i32, i32, i32
  }
  func.func @transform_10(%arg0: i32) -> (i32, i32, i32) {
    %c0_i32 = arith.constant 0 : i32
    %c0_i32_0 = arith.constant 0 : i32
    %c0_i32_1 = arith.constant 0 : i32
    %c0_i32_2 = arith.constant 0 : i32
    return %c0_i32, %c0_i32_0, %c0_i32_1 : i32, i32, i32
  }
  func.func @transform_11(%arg0: i32) -> (i32, i32, i32) {
    %c0_i32 = arith.constant 0 : i32
    %c0_i32_0 = arith.constant 0 : i32
    %c0_i32_1 = arith.constant 0 : i32
    %c0_i32_2 = arith.constant 0 : i32
    return %c0_i32, %c0_i32_0, %c0_i32_1 : i32, i32, i32
  }
  func.func @transform_12(%arg0: i32) -> (i32, i32, i32) {
    %c0_i32 = arith.constant 0 : i32
    %c0_i32_0 = arith.constant 0 : i32
    %c0_i32_1 = arith.constant 0 : i32
    %c0_i32_2 = arith.constant 0 : i32
    return %c0_i32, %c0_i32_0, %c0_i32_1 : i32, i32, i32
  }
  func.func @transform_13(%arg0: i32) -> (i32, i32, i32) {
    %c0_i32 = arith.constant 0 : i32
    %c0_i32_0 = arith.constant 0 : i32
    %c0_i32_1 = arith.constant 0 : i32
    %c0_i32_2 = arith.constant 0 : i32
    return %c0_i32, %c0_i32_0, %c0_i32_1 : i32, i32, i32
  }
  func.func @transform_14(%arg0: i32) -> (i32, i32, i32) {
    %c0_i32 = arith.constant 0 : i32
    %c0_i32_0 = arith.constant 0 : i32
    %c0_i32_1 = arith.constant 0 : i32
    %c0_i32_2 = arith.constant 0 : i32
    return %c0_i32, %c0_i32_0, %c0_i32_1 : i32, i32, i32
  }
  func.func @transform_15(%arg0: i32) -> (i32, i32, i32) {
    %c0_i32 = arith.constant 0 : i32
    %c0_i32_0 = arith.constant 0 : i32
    %c0_i32_1 = arith.constant 0 : i32
    %c0_i32_2 = arith.constant 0 : i32
    return %c0_i32, %c0_i32_0, %c0_i32_1 : i32, i32, i32
  }
  func.func @transform_16(%arg0: i32) -> (i32, i32, i32) {
    %c0_i32 = arith.constant 0 : i32
    %c0_i32_0 = arith.constant 0 : i32
    %c0_i32_1 = arith.constant 0 : i32
    return %arg0, %c0_i32, %c0_i32_0 : i32, i32, i32
  }
}

</mosaic_0001>

<bundles_post_ra>
// kernel: sentence_transformer_forward.1
= control target key start
LH: loop header
LB: loop body
LE: loop exit
PB: predicated region body
PF: predicated region fallthrough
CT: control target
= control target key end

     0   :  { %s4458_s0 = inlined_call_operand.vmem [shape: f32[2,8,32], index: 0, kind: input, shape index: {}]   ;;  %s4459_s1 = inlined_call_operand.vmem [shape: f32[2,1,8], index: 1, kind: input, shape index: {}]   ;;  %s4460_s2 = inlined_call_operand.vmem [shape: f32[1,32], index: 2, kind: input, shape index: {}]   ;;  %s4461_s3 = inlined_call_operand.vmem [shape: f32[1,32], index: 3, kind: input, shape index: {}]   ;;  %s4462_s4 = inlined_call_operand.vmem [shape: f32[2,32,96], index: 4, kind: input, shape index: {}]   ;;  %s4463_s5 = inlined_call_operand.vmem [shape: f32[2,1,96], index: 5, kind: input, shape index: {}]   ;;  %s4464_s6 = inlined_call_operand.vmem [shape: f32[2,32,32], index: 6, kind: input, shape index: {}]   ;;  %s4465_s7 = inlined_call_operand.vmem [shape: f32[2,1,32], index: 7, kind: input, shape index: {}]   ;;  %s4466_s8 = inlined_call_operand.vmem [shape: f32[2,1,32], index: 8, kind: input, shape index: {}]   ;;  %s4467_s9 = inlined_call_operand.vmem [shape: f32[2,1,32], index: 9, kind: input, shape index: {}]   ;;  %s4468_s10 = inlined_call_operand.vmem [shape: f32[2,32,64], index: 10, kind: input, shape index: {}]   ;;  %s4469_s11 = inlined_call_operand.vmem [shape: f32[2,1,64], index: 11, kind: input, shape index: {}]   ;;  %s4470_s12 = inlined_call_operand.vmem [shape: f32[2,64,32], index: 12, kind: input, shape index: {}]   ;;  %s4471_s13 = inlined_call_operand.vmem [shape: f32[2,1,32], index: 13, kind: input, shape index: {}]   ;;  %s4472_s14 = inlined_call_operand.vmem [shape: f32[2,1,32], index: 14, kind: input, shape index: {}]   ;;  %s4473_s15 = inlined_call_operand.vmem [shape: f32[2,1,32], index: 15, kind: input, shape index: {}]   ;;  %s4474_s16 = inlined_call_operand.hbm [shape: f32[2,1,32], index: 16, kind: output, shape index: {}]  }
   0x1   :  { %4488 = sst [smem:[#allocation9_spill]] %s4458_s0 }
   0x2   :  { %4489 = sst [smem:[#allocation10_spill]] %s4459_s1 }
   0x3   :  { %21 = vsyncpa [#allocation3], 0 }
   0x4   :  { %23 = vsyncpa [#allocation3 + $0x1], 0  ;;  %s3944_s21 = smov 0   ;;  %s3946_s22 = smov 0  }
   0x5   :  { %s3948_s23 = smov 0   ;;  %s3950_s24 = smov 0  }
   0x6 LB: > { %4490 = sst [smem:[#allocation5_spill]] %s3838_s23  ;;  %s3965_s25 = sadd.s32 4294967295, %s3842_s24   ;;  %s3842_s24 = sphi %s3950_s24, %s4508_s24   ;;  %s3838_s23 = sphi %s3948_s23, %s4510_s23   ;;  %s3834_s22 = sphi %s3946_s22, %s4512_s22   ;;  %s3830_s21 = sphi %s3944_s21, %s4511_s21  }
   0x7   : > { %s3253_s26 = sadd.s32 4294967294, %s3842_s24   ;;  %s3969_s27 = sadd.s32 1, %s3842_s24  }
   0x8   : > { %4491 = sst [smem:[#allocation6_spill]] %s3969_s27  ;;  %s382_s28 = sadd.s32 1, %s3838_s23 }
   0x9   : > { %s379_s29 = ssub.s32 %s3842_s24, %s3969_s27  ;;  %p392_p0 = scmp.ne.s32.totalorder %s3838_s23, %s3834_s22 }
   0xa   : > { %p380_p1 = scmp.eq.s32.totalorder %s379_s29, 0  ;;  %p393_p2 = scmp.eq.s32.totalorder %s3965_s25, 1 }
   0xb   : > { %p398_p3 = scmp.ne.s32.totalorder %s3834_s22, %s3830_s21  ;;  %p399_p4 = scmp.eq.s32.totalorder %s3253_s26, 1 }
   0xc   : > { %s3980_s30 = scalar_select %p380_p1, %s3838_s23, %s382_s28  }
   0xd   : > { %p3982_p5 = por %p393_p2, %p392_p0  ;;  %p3986_p6 = por %p399_p4, %p398_p3 }
   0xe   : > { %4492 = sst [smem:[#allocation7_spill]] %s3980_s30  ;;  %p3256_p7 = scmp.ge.s32.totalorder %s3842_s24, 1 }
   0xf   : > { %s4494_s17 = scalar_select %p3986_p6, 1, 0 }
  0x10   : > { %p472_p8 = scmp.lt.s32.totalorder %s3842_s24, 3 }
  0x11   : > { %4495 = sst [smem:[#allocation8_spill]] %s4494_s17 }
  0x12   : > { %p473_p9 = pnand %p3256_p7, %p472_p8 }
  0x13   : > { %p523_p10 = scmp.lt.s32.totalorder (!%p473_p9), %s3965_s25, 1  ;;  %vm533_vm0 = vcmask (!%p473_p9), 261120   ;;  %s4496_s28 = sld [smem:[#allocation9_spill]] (!%p473_p9)  ;;  %v565_v7 = vld [vmem:[%s4462_s4] sm:$0xff] (!%p473_p9)  ;;  %v566_v8 = vld [vmem:[%s4462_s4 + $0x8] sm:$0xff] (!%p473_p9)  ;;  %v567_v9 = vld [vmem:[%s4462_s4 + $0x10] sm:$0xff] (!%p473_p9)  ;;  %v654_v31 = vlaneseq (!%p473_p9) }
  0x14   : > { %476 = sbr.rel (%p473_p9) target bundleno = 7680 (0x1e00), region = 84  ;;  %v3844_v10 = vmov (!%p473_p9), 0.0|0.0   ;;  %v3634_v11 = vpack.c.bf16 (!%p473_p9), %v566_v8, %v565_v7  ;;  %v568_v12 = vld [vmem:[%s4462_s4 + $0x18] sm:$0xff] (!%p473_p9)  ;;  %vm3845_vm1 = vmmov (!%p473_p9), 0   ;;  %v3846_v13 = vmov (!%p473_p9), 0.0   ;;  %s4487_s20 = smov (!%p473_p9), 120  }
  0x15   : > { %3633 = vmatprep.subr.bf16.mxu0 (!%p473_p9), %v3844_v10  ;;  %3439 = vmatprep.mubr.msk.f32.mxu0 (!%p473_p9), %vm3845_vm1, %v3846_v13  ;;  %v3637_v14 = vpack.c.bf16 (!%p473_p9), %v568_v12, %v567_v9  ;;  %v3258_v19 = vld [vmem:[%s4460_s2] ss:$0 sm:$0xff] (!%p473_p9)  ;;  %s3848_s26 = smov (!%p473_p9), 96   ;;  %vm662_vm2 = vcmask (!%p473_p9), 64512   ;;  %s4497_s1 = sld [smem:[#allocation10_spill]] (!%p473_p9)  ;;  %v655_v34 = vshrl.u32 (!%p473_p9), %v654_v31, 7 }
  0x16   : > { %3447 = vmatprep.subr.mxu1 (!%p473_p9), %v3846_v13  ;;  %3449 = vmatprep.mubr.msk.f32.mxu1 (!%p473_p9), %vm3845_vm1, %v3846_v13  ;;  %v3259_v21 = vld [vmem:[%s4461_s3] ss:$0 sm:$0xff] (!%p473_p9)  ;;  %s4484_s17 = smov (!%p473_p9), 64   ;;  %v650_v56 = vld [vmem:[%s4464_s6 + $0x8] sm:$0xff] (!%p473_p9)  ;;  %s4479_s27 = smov (!%p473_p9), 48   ;;  %vm1759_vm3 = vcmask (!%p473_p9), 523264  }
  0x17   : > { %3635 = vmatpush3.bf16.msra.mxu0 (!%p473_p9), %v3634_v11  ;;  %v3260_v24 = vld [vmem:[%s4463_s5] ss:$0 sm:$0xff] (!%p473_p9)  ;;  %v656_v36 = vsub.s32 (!%p473_p9), 0, %v655_v34  ;;  %s4481_s23 = smov (!%p473_p9), 72   ;;  %vm3174_vm4 = vcmask (!%p473_p9), 253952  }
  0x18   : > { %3636 = vmatprep.subr.bf16.mxu0 (!%p473_p9), %v3844_v10 }
  0x1b   : > { %s3994_s18 = scalar_select %p523_p10, %s3965_s25, 1  ;;  %3638 = vmatpush3.bf16.msra.mxu0 %v3637_v14 }
  0x1c   : > { %3442 = vmatprep.subr.mxu0 %v3846_v13 }
  0x1d   : > { %s3257_s19 = sshll.u32 %s3994_s18, 3  ;;  %s529_s30 = scalar_lea.vmem %s4497_s1, %s3994_s18 }
  0x1e   : > { %s526_s29 = scalar_lea.vmem %s4496_s28, %s3257_s19  ;;  %s3849_s28 = smov 88   ;;  %v562_v32 = vld [vmem:[%s529_s30] sm:$0x1] }
  0x1f   : > { %v530_v0 = vld [vmem:[%s526_s29] sm:$0xff]  ;;  %v563_v33 = vsub.f32 1.0, %v562_v32  ;;  %s4486_s18 = smov 56   ;;  %s4485_s29 = smov 80   ;;  %v651_v32 = vld [vmem:[%s4464_s6 + $0x10] sm:$0xff] }
  0x20   : > { %v534_v1 = vsel %vm533_vm0, %v530_v0, 0.0  ;;  %s4483_s19 = smov 112   ;;  %s4480_s30 = smov 104  }
  0x21   : > { %535 = vadd.xlane.f32.xlu0 %v534_v1  ;;  %v564_v35 = vmul.f32 -1e+09, %v563_v33  ;;  %v649_v1 = vld [vmem:[%s4464_s6] sm:$0xff] }
  0x23   : > { %v4060_v37 = vrot.slane %v564_v35, %v656_v36 }
  0xae   : > { %v536_v2 = vpop.xlane.xlu0 %535 }
  0xaf   : > { %v538_v3 = vmul.f32 0.03125, %v536_v2 }
  0xb1   : > { %v539_v4 = vsub.f32 %v530_v0, %v538_v3 }
  0xb3   : > { %v540_v5 = vmul.f32 %v539_v4, %v539_v4 }
  0xb5   : > { %v541_v6 = vsel %vm533_vm0, %v540_v5, 0.0 }
  0xb6   : > { %542 = vadd.xlane.f32.xlu0 %v541_v6 }
 0x143   : > { %v543_v15 = vpop.xlane.xlu0 %542 }
 0x144   : > { %v544_v16 = vmul.f32 0.03125, %v543_v15 }
 0x146   : > { %v545_v17 = vadd.f32 1e-12, %v544_v16 }
 0x148   : > { %3734 = vrsqrt.f32 %v545_v17 }
 0x152   : > { %v3735_v18 = vpop.eup %3734 }
 0x153   : > { %v547_v20 = vmul.f32 %v3735_v18, %v539_v4 }
 0x155   : > { %v554_v22 = vmul.f32 %v3258_v19, %v547_v20 }
 0x157   : > { %v4028_v23 = vadd.f32 %v3259_v21, %v554_v22 }
 0x159   : > { %3440 = vmatmul.mubr.msk.f32.vlgmr.msra.gmra.mrb[0].mxu0 %vm533_vm0, %v4028_v23 }
 0x15a   : > { %3444 = vmatprep.mubr.msk.f32.mxu0 %vm3845_vm1, %v3846_v13 }
 0x22c   : > { %v645_v25 = vpop.f32.mrb[0].mxu0 }
 0x22d   : > { %v4037_v26 = vadd.f32 %v3260_v24, %v645_v25  ;;  %v3441_v27 = vpop.f32.mrb[1].mxu0 }
 0x22f   : > { %824 = vrot.lane.b32.xlu0 %v4037_v26, %s4487_s20  ;;  %660 = vrot.lane.b32.xlu1 %v4037_v26, %s3848_s26 }
 0x233   : > { %826 = vrot.lane.b32.xlu1 %v4037_v26, %s3849_s28 }
 0x2a1   : > { %v661_v28 = vpop.permute.xlu1 %660  ;;  %v825_v30 = vpop.permute.xlu0 %824 }
 0x2a2   : > { %3443 = vmatpush3.xpose.msk.msra.mxu0 %vm662_vm2, %v661_v28 }
 0x2a3   : > { %3452 = vmatprep.subr.mxu0 %v3846_v13 }
 0x2a5   : > { %3445 = vmatmul.mubr.msk.f32.vlgmr.msra.gmra.mrb[2].mxu0 %vm662_vm2, %v4037_v26  ;;  %v827_v29 = vpop.permute.xlu1 %826 }
 0x2a6   : > { %3453 = vmatpush3.xpose.msk.msra.mxu0 %vm662_vm2, %v827_v29  ;;  %3454 = vmatprep.mubr.msk.f32.mxu0 %vm3845_vm1, %v3846_v13 }
 0x2a7   : > { %3462 = vmatprep.subr.mxu0 %v3846_v13 }
 0x2a9   : > { %3455 = vmatmul.mubr.msk.f32.vlgmr.msra.gmra.mrb[4].mxu0 %vm662_vm2, %v825_v30 }
 0x2aa   : > { %3464 = vmatprep.mubr.msk.f32.mxu0 %vm3845_vm1, %v3846_v13  ;;  %3463 = vmatpush3.msra.mxu0 %v650_v56 }
 0x2ab   : > { %3472 = vmatprep.subr.mxu0 %v3846_v13 }
 0x378   : > { %v733_v38 = vpop.f32.mrb[2].mxu0 }
 0x379   : > { %v734_v39 = vadd.f32 %v733_v38, %v4060_v37  ;;  %v3446_v40 = vpop.f32.mrb[3].mxu0 }
 0x37b   : > { %v737_v41 = vsel %vm662_vm2, %v734_v39, -inf }
 0x37c   : > { %738 = vmax.xlane.f32.xlu1 %v737_v41  ;;  %v898_v42 = vpop.f32.mrb[4].mxu0 }
 0x37d   : > { %v899_v43 = vadd.f32 %v898_v42, %v4060_v37  ;;  %v3456_v44 = vpop.f32.mrb[5].mxu0 }
 0x37f   : > { %v902_v45 = vsel %vm662_vm2, %v899_v43, -inf }
 0x380   : > { %903 = vmax.xlane.f32.xlu0 %v902_v45  ;;  %v652_v45 = vld [vmem:[%s4464_s6 + $0x18] sm:$0xff] }
 0x396   : > { %913 = vrot.lane.b32.xlu0 %v4037_v26, %s4486_s18  ;;  %s4503_s18 = smov 72  }
 0x409   : > { %v739_v46 = vpop.xlane.xlu1 %738 }
 0x40a   : > { %v740_v47 = vsub.f32 %v734_v39, %v739_v46 }
 0x40c   : > { %v741_v48 = vmul.f32 1.442695, %v740_v47 }
 0x40d   : > { %v904_v49 = vpop.xlane.xlu0 %903 }
 0x40e   : > { %3736 = vpow2.f32 %v741_v48  ;;  %v905_v50 = vsub.f32 %v899_v43, %v904_v49 }
 0x410   : > { %v906_v51 = vmul.f32 1.442695, %v905_v50 }
 0x411   : > { %v914_v62 = vpop.permute.xlu0 %913 }
 0x412   : > { %3738 = vpow2.f32 %v906_v51 }
 0x418   : > { %v3737_v52 = vpop.eup %3736 }
 0x419   : > { %v743_v53 = vsel %vm662_vm2, %v3737_v52, 0.0 }
 0x41a   : > { %744 = vadd.xlane.f32.xlu1 %v743_v53 }
 0x41c   : > { %v3739_v54 = vpop.eup %3738 }
 0x41d   : > { %v908_v55 = vsel %vm662_vm2, %v3739_v54, 0.0 }
 0x41e   : > { %909 = vadd.xlane.f32.xlu1 %v908_v55  ;;  %v3278_v55 = vld [vmem:[%s4465_s7] ss:$0 sm:$0xff] }
 0x42f   : > { %748 = vrot.lane.b32.xlu1 %v4037_v26, %s4484_s17  ;;  %s3342_s17 = sshll.u32 %s3965_s25, 4  ;;  %s3858_s25 = smov [#allocation2]  }
 0x433   : > { %1137 = vrot.lane.b32.xlu1 %v4037_v26, %s4485_s29 }
 0x437   : > { %1135 = vrot.lane.b32.xlu1 %v4037_v26, %s4483_s19  ;;  %s4502_s19 = smov 112  }
 0x4a7   : > { %v745_v57 = vpop.xlane.xlu1 %744 }
 0x4a8   : > { %3740 = vrcp.f32 %v745_v57 }
 0x4ab   : > { %v910_v58 = vpop.xlane.xlu1 %909 }
 0x4ac   : > { %3742 = vrcp.f32 %v910_v58 }
 0x4af   : > { %v749_v59 = vpop.permute.xlu1 %748 }
 0x4b0   : > { %3448 = vmatpush3.msra.mxu1 %v749_v59 }
 0x4b1   : > { %3457 = vmatprep.subr.mxu1 %v3846_v13 }
 0x4b2   : > { %v3741_v60 = vpop.eup %3740 }
 0x4b3   : > { %v747_v61 = vmul.f32 %v3741_v60, %v3737_v52  ;;  %v1138_v4 = vpop.permute.xlu1 %1137 }
 0x4b5   : > { %3450 = vmatmul.mubr.msk.f32.vlgmr.msra.gmra.mrb[0].mxu1 %vm662_vm2, %v747_v61 }
 0x4b6   : > { %v3743_v63 = vpop.eup %3742  ;;  %3458 = vmatpush3.msra.mxu1 %v914_v62  ;;  %3459 = vmatprep.mubr.msk.f32.mxu1 %vm3845_vm1, %v3846_v13 }
 0x4b7   : > { %v912_v0 = vmul.f32 %v3743_v63, %v3739_v54  ;;  %3467 = vmatprep.subr.mxu1 %v3846_v13  ;;  %v1136_v7 = vpop.permute.xlu1 %1135 }
 0x4b9   : > { %3460 = vmatmul.mubr.msk.f32.vlgmr.msra.gmra.mrb[2].mxu1 %vm662_vm2, %v912_v0 }
 0x4ba   : > { %3469 = vmatprep.mubr.msk.f32.mxu1 %vm3845_vm1, %v3846_v13  ;;  %3468 = vmatpush3.msra.mxu1 %v649_v1 }
 0x4bb   : > { %3477 = vmatprep.subr.mxu1 %v3846_v13 }
 0x588   : > { %v820_v2 = vpop.f32.mrb[0].mxu1 }
 0x589   : > { %v3451_v3 = vpop.f32.mrb[1].mxu1  ;;  %3470 = vmatmul.mubr.msk.f32.vlgmr.msra.gmra.mrb[4].mxu1 %vm662_vm2, %v820_v2  ;;  %v1651_v2 = vld [vmem:[%s4468_s10] sm:$0xff] }
 0x58a   : > { %3479 = vmatprep.mubr.msk.f32.mxu1 %vm3845_vm1, %v3846_v13  ;;  %v1652_v3 = vld [vmem:[%s4468_s10 + $0x8] sm:$0xff] }
 0x58c   : > { %v985_v5 = vpop.f32.mrb[2].mxu1 }
 0x58d   : > { %v3461_v6 = vpop.f32.mrb[3].mxu1  ;;  %3465 = vmatmul.mubr.msk.f32.vlgmr.msra.gmra.mrb[6].mxu0 %vm662_vm2, %v985_v5  ;;  %v1654_v5 = vld [vmem:[%s4468_s10 + $0x18] sm:$0xff] }
 0x58e   : > { %3473 = vmatpush3.xpose.msk.msra.mxu0 %vm662_vm2, %v1138_v4  ;;  %3474 = vmatprep.mubr.msk.f32.mxu0 %vm3845_vm1, %v3846_v13  ;;  %v3640_v4 = vpack.c.bf16 %v1652_v3, %v1651_v2  ;;  %v3285_v2 = vld [vmem:[%s4472_s14] ss:$0 sm:$0xff] }
 0x58f   : > { %3482 = vmatprep.subr.mxu0 %v3846_v13 }
 0x591   : > { %3475 = vmatmul.mubr.msk.f32.vlgmr.msra.gmra.mrb[8].mxu0 %vm662_vm2, %v1136_v7 }
 0x592   : > { %3484 = vmatprep.mubr.msk.f32.mxu0 %vm3845_vm1, %v3846_v13  ;;  %3483 = vmatpush3.msra.mxu0 %v651_v32  ;;  %v3281_v32 = vld [vmem:[%s4469_s11] ss:$0 sm:$0xff] }
 0x593   : > { %3492 = vmatprep.subr.mxu0 %v3846_v13 }
 0x65c   : > { %v1131_v8 = vpop.f32.mrb[4].mxu1 }
 0x65d   : > { %v3471_v9 = vpop.f32.mrb[5].mxu1 }
 0x660   : > { %v1058_v11 = vpop.f32.mrb[6].mxu0 }
 0x661   : > { %v1132_v12 = vadd.f32 %v1131_v8, %v1058_v11  ;;  %v3466_v14 = vpop.f32.mrb[7].mxu0 }
 0x664   : > { %v1209_v15 = vpop.f32.mrb[8].mxu0 }
 0x665   : > { %v1210_v16 = vadd.f32 %v1209_v15, %v4060_v37  ;;  %v3476_v17 = vpop.f32.mrb[9].mxu0  ;;  %v3280_v15 = vld [vmem:[%s4467_s9] ss:$0 sm:$0xff] }
 0x667   : > { %v1213_v18 = vsel %vm662_vm2, %v1210_v16, -inf }
 0x668   : > { %1214 = vmax.xlane.f32.xlu1 %v1213_v18  ;;  %v1744_v18 = vld [vmem:[%s4470_s12] sm:$0xff] }
 0x679   : > { %1224 = vrot.lane.b32.xlu1 %v4037_v26, %s4479_s27  ;;  %s4482_s27 = smov 40  }
 0x67d   : > { %1374 = vrot.lane.b32.xlu1 %v4037_v26, %s4480_s30  ;;  %s4501_s30 = smov 64  }
 0x6f5   : > { %v1215_v19 = vpop.xlane.xlu1 %1214 }
 0x6f6   : > { %v1216_v20 = vsub.f32 %v1210_v16, %v1215_v19  ;;  %v1745_v19 = vld [vmem:[%s4470_s12 + $0x8] sm:$0xff] }
 0x6f8   : > { %v1217_v21 = vmul.f32 1.442695, %v1216_v20  ;;  %v3646_v20 = vpack.c.bf16 %v1745_v19, %v1744_v18 }
 0x6f9   : > { %v1225_v22 = vpop.permute.xlu1 %1224 }
 0x6fa   : > { %3744 = vpow2.f32 %v1217_v21  ;;  %3478 = vmatpush3.msra.mxu1 %v1225_v22  ;;  %v1746_v21 = vld [vmem:[%s4470_s12 + $0x10] sm:$0xff]  ;;  %v1747_v22 = vld [vmem:[%s4470_s12 + $0x18] sm:$0xff] }
 0x6fb   : > { %3487 = vmatprep.subr.mxu1 %v3846_v13 }
 0x6fd   : > { %v1375_v31 = vpop.permute.xlu1 %1374 }
 0x704   : > { %v3745_v24 = vpop.eup %3744 }
 0x705   : > { %v1219_v25 = vsel %vm662_vm2, %v3745_v24, 0.0 }
 0x706   : > { %1220 = vadd.xlane.f32.xlu0 %v1219_v25  ;;  %v1748_v25 = vld [vmem:[%s4470_s12 + $0x20] sm:$0xff] }
 0x71c   : > { %1376 = vrot.lane.b32.xlu0 %v4037_v26, %s4481_s23  ;;  %s4498_s23 = smov 120  }
 0x793   : > { %v1221_v27 = vpop.xlane.xlu0 %1220 }
 0x794   : > { %3746 = vrcp.f32 %v1221_v27  ;;  %v1749_v27 = vld [vmem:[%s4470_s12 + $0x28] sm:$0xff] }
 0x797   : > { %v1377_v30 = vpop.permute.xlu0 %1376 }
 0x79e   : > { %v3747_v28 = vpop.eup %3746 }
 0x79f   : > { %v1223_v29 = vmul.f32 %v3747_v28, %v3745_v24  ;;  %v3649_v24 = vpack.c.bf16 %v1747_v22, %v1746_v21  ;;  %v3652_v28 = vpack.c.bf16 %v1749_v27, %v1748_v25 }
 0x7a1   : > { %3480 = vmatmul.mubr.msk.f32.vlgmr.msra.gmra.mrb[6].mxu1 %vm662_vm2, %v1223_v29  ;;  %v1750_v29 = vld [vmem:[%s4470_s12 + $0x30] sm:$0xff] }
 0x7a2   : > { %3488 = vmatpush3.xpose.msk.msra.mxu1 %vm662_vm2, %v1377_v30  ;;  %3489 = vmatprep.mubr.msk.f32.mxu1 %vm3845_vm1, %v3846_v13  ;;  %v1751_v30 = vld [vmem:[%s4470_s12 + $0x38] sm:$0xff] }
 0x7a3   : > { %3497 = vmatprep.subr.mxu1 %v3846_v13 }
 0x7a5   : > { %3490 = vmatmul.mubr.msk.f32.vlgmr.msra.gmra.mrb[8].mxu1 %vm662_vm2, %v1375_v31  ;;  %v3655_v31 = vpack.c.bf16 %v1751_v30, %v1750_v29 }
 0x7a6   : > { %3499 = vmatprep.mubr.msk.f32.mxu1 %vm3845_vm1, %v3846_v13  ;;  %3498 = vmatpush3.msra.mxu1 %v652_v45 }
 0x7a7   : > { %3645 = vmatprep.subr.bf16.mxu1 %v3844_v10 }
 0x874   : > { %v1296_v33 = vpop.f32.mrb[6].mxu1 }
 0x875   : > { %v3481_v34 = vpop.f32.mrb[7].mxu1  ;;  %3485 = vmatmul.mubr.msk.f32.vlgmr.msra.gmra.mrb[10].mxu0 %vm662_vm2, %v1296_v33 }
 0x876   : > { %3494 = vmatprep.mubr.msk.f32.mxu0 %vm3845_vm1, %v3846_v13 }
 0x878   : > { %v1448_v35 = vpop.f32.mrb[8].mxu1 }
 0x879   : > { %v1449_v36 = vadd.f32 %v1448_v35, %v4060_v37  ;;  %v3491_v38 = vpop.f32.mrb[9].mxu1 }
 0x87b   : > { %v1452_v39 = vsel %vm662_vm2, %v1449_v36, -inf }
 0x87c   : > { %1453 = vmax.xlane.f32.xlu1 %v1452_v39 }
 0x909   : > { %v1454_v40 = vpop.xlane.xlu1 %1453 }
 0x90a   : > { %v1455_v41 = vsub.f32 %v1449_v36, %v1454_v40 }
 0x90c   : > { %v1456_v42 = vmul.f32 1.442695, %v1455_v41 }
 0x90e   : > { %3748 = vpow2.f32 %v1456_v42 }
 0x918   : > { %v3749_v43 = vpop.eup %3748 }
 0x919   : > { %v1458_v44 = vsel %vm662_vm2, %v3749_v43, 0.0 }
 0x91a   : > { %1459 = vadd.xlane.f32.xlu0 %v1458_v44 }
 0x930   : > { %1463 = vrot.lane.b32.xlu0 %v4037_v26, %s4482_s27  ;;  %s521_s27 = sand.u32 1, %s3834_s22  }
 0x931   : > { %s522_s29 = scalar_lea.vmem [#allocation2], %s521_s27 }
 0x932   : > { %s3189_s20 = sshll.u32 %s522_s29, 4  ;;  %s4418_s20 = int_to_ptr.vmem [resolvable:$true] %s3189_s20 }
 0x948   : > { %v1369_v46 = vpop.f32.mrb[10].mxu0 }
 0x949   : > { %v1373_v47 = vadd.f32 %v1369_v46, %v1132_v12  ;;  %v3486_v48 = vpop.f32.mrb[11].mxu0  ;;  %v3279_v12 = vld [vmem:[%s4466_s8] ss:$0 sm:$0xff] }
 0x94a   : > { %v3283_v46 = vld [vmem:[%s4471_s13] ss:$0 sm:$0xff] }
 0x9a7   : > { %v1460_v49 = vpop.xlane.xlu0 %1459 }
 0x9a8   : > { %3750 = vrcp.f32 %v1460_v49 }
 0x9ab   : > { %v1464_v50 = vpop.permute.xlu0 %1463 }
 0x9ac   : > { %3493 = vmatpush3.msra.mxu0 %v1464_v50 }
 0x9ad   : > { %3639 = vmatprep.subr.bf16.mxu0 %v3844_v10 }
 0x9b2   : > { %v3751_v51 = vpop.eup %3750 }
 0x9b3   : > { %v1462_v52 = vmul.f32 %v3751_v51, %v3749_v43 }
 0x9b5   : > { %3495 = vmatmul.mubr.msk.f32.vlgmr.msra.gmra.mrb[12].mxu0 %vm662_vm2, %v1462_v52 }
 0x9b6   : > { %3510 = vmatprep.mubr.msk.f32.mxu0 %vm3845_vm1, %v3846_v13  ;;  %3641 = vmatpush3.bf16.msra.mxu0 %v3640_v4  ;;  %v3286_v4 = vld [vmem:[%s4473_s15] ss:$0 sm:$0xff] }
 0x9b7   : > { %3642 = vmatprep.subr.bf16.mxu0 %v3844_v10 }
 0xa88   : > { %v1535_v26 = vpop.f32.mrb[12].mxu0 }
 0xa89   : > { %v3496_v53 = vpop.f32.mrb[13].mxu0  ;;  %3500 = vmatmul.mubr.msk.f32.vlgmr.msra.gmra.mrb[10].mxu1 %vm662_vm2, %v1535_v26 }
 0xa8a   : > { %3529 = vmatprep.mubr.msk.f32.mxu1 %vm3845_vm1, %v3846_v13  ;;  %3647 = vmatpush3.bf16.msra.mxu1 %v3646_v20 }
 0xa8b   : > { %3648 = vmatprep.subr.bf16.mxu1 %v3844_v10 }
 0xa8e   : > { %3650 = vmatpush3.bf16.msra.mxu1 %v3649_v24 }
 0xa8f   : > { %3651 = vmatprep.subr.bf16.mxu1 %v3844_v10 }
 0xa92   : > { %3653 = vmatpush3.bf16.msra.mxu1 %v3652_v28 }
 0xa93   : > { %3654 = vmatprep.subr.bf16.mxu1 %v3844_v10 }
 0xa96   : > { %3656 = vmatpush3.bf16.msra.mxu1 %v3655_v31 }
 0xa97   : > { %3548 = vmatprep.subr.mxu1 %v3846_v13 }
 0xb5c   : > { %v1608_v54 = vpop.f32.mrb[10].mxu1 }
 0xb5d   : > { %v1612_v56 = vadd.f32 %v1608_v54, %v1373_v47  ;;  %v3501_v57 = vpop.f32.mrb[11].mxu1 }
 0xb5e   : > { %v3288_v57 = vld [vmem:[%s4462_s4 + $0x28] sm:$0xff] }
 0xb5f   : > { %v1620_v58 = vadd.f32 %v3278_v55, %v1612_v56  ;;  %v3287_v56 = vld [vmem:[%s4462_s4 + $0x20] sm:$0xff] }
 0xb61   : > { %v1621_v59 = vadd.f32 %v1620_v58, %v4028_v23  ;;  %v1653_v23 = vld [vmem:[%s4468_s10 + $0x10] sm:$0xff]  ;;  %v3658_v58 = vpack.c.bf16 %v3288_v57, %v3287_v56 }
 0xb62   : > { %v3643_v6 = vpack.c.bf16 %v1654_v5, %v1653_v23 }
 0xb63   : > { %v1624_v60 = vsel %vm533_vm0, %v1621_v59, 0.0 }
 0xb64   : > { %1625 = vadd.xlane.f32.xlu1 %v1624_v60  ;;  %3644 = vmatpush3.bf16.msra.mxu0 %v3643_v6  ;;  %v3290_v60 = vld [vmem:[%s4462_s4 + $0x38] sm:$0xff]  ;;  %v3292_v6 = vld [vmem:[%s4463_s5 + $0x1] ss:$0 sm:$0xff] }
 0xb65   : > { %3657 = vmatprep.subr.bf16.mxu0 %v3844_v10 }
 0xbf1   : > { %v1626_v61 = vpop.xlane.xlu1 %1625 }
 0xbf2   : > { %v1627_v62 = vmul.f32 0.03125, %v1626_v61 }
 0xbf4   : > { %v1628_v63 = vsub.f32 %v1621_v59, %v1627_v62  ;;  %v3289_v59 = vld [vmem:[%s4462_s4 + $0x30] sm:$0xff] }
 0xbf5   : > { %v3661_v61 = vpack.c.bf16 %v3290_v60, %v3289_v59 }
 0xbf6   : > { %v1629_v0 = vmul.f32 %v1628_v63, %v1628_v63 }
 0xbf8   : > { %v1630_v1 = vsel %vm533_vm0, %v1629_v0, 0.0 }
 0xbf9   : > { %1631 = vadd.xlane.f32.xlu1 %v1630_v1 }
 0xc86   : > { %v1632_v7 = vpop.xlane.xlu1 %1631 }
 0xc87   : > { %v1633_v8 = vmul.f32 0.03125, %v1632_v7 }
 0xc89   : > { %v1634_v9 = vadd.f32 1e-12, %v1633_v8 }
 0xc8b   : > { %3752 = vrsqrt.f32 %v1634_v9 }
 0xc95   : > { %v3753_v11 = vpop.eup %3752 }
 0xc96   : > { %v1636_v14 = vmul.f32 %v3753_v11, %v1628_v63 }
 0xc98   : > { %v1643_v16 = vmul.f32 %v3279_v12, %v1636_v14 }
 0xc9a   : > { %v1650_v17 = vadd.f32 %v3280_v15, %v1643_v16 }
 0xc9c   : > { %3511 = vmatmul.mubr.msk.f32.vlgmr.msra.gmra.mrb[14].mxu0 %vm533_vm0, %v1650_v17 }
 0xc9d   : > { %3540 = vmatprep.mubr.msk.f32.mxu0 %vm3845_vm1, %v3846_v13  ;;  %3659 = vmatpush3.bf16.msra.mxu0 %v3658_v58 }
 0xc9e   : > { %3660 = vmatprep.subr.bf16.mxu0 %v3844_v10 }
 0xca1   : > { %3662 = vmatpush3.bf16.msra.mxu0 %v3661_v61 }
 0xca2   : > { %3543 = vmatprep.subr.mxu0 %v3846_v13 }
 0xd6f   : > { %v1731_v33 = vpop.f32.mrb[14].mxu0 }
 0xd70   : > { %v1732_v34 = vadd.f32 %v3281_v32, %v1731_v33  ;;  %v3512_v35 = vpop.f32.mrb[15].mxu0 }
 0xd71   : > { %v3295_v35 = vld [vmem:[%s4464_s6 + $0x28] sm:$0xff] }
 0xd72   : > { %v1735_v36 = vmul.f32 %v1732_v34, %v1732_v34 }
 0xd74   : > { %v1736_v38 = vmul.f32 %v1735_v36, %v1732_v34 }
 0xd76   : > { %v1737_v39 = vmul.f32 0.044715, %v1736_v38 }
 0xd78   : > { %v1738_v40 = vadd.f32 %v1737_v39, %v1732_v34 }
 0xd7a   : > { %v1739_v41 = vmul.f32 0.7978846, %v1738_v40 }
 0xd7c   : > { %3754 = vtanh.f32 %v1739_v41 }
 0xd86   : > { %v3755_v42 = vpop.eup %3754 }
 0xd87   : > { %v1741_v43 = vadd.f32 1.0, %v3755_v42 }
 0xd89   : > { %v1742_v44 = vmul.f32 0.5, %v1741_v43 }
 0xd8b   : > { %v1743_v45 = vmul.f32 %v1742_v44, %v1732_v34 }
 0xd8d   : > { %3530 = vmatmul.mubr.msk.f32.vlgmr.msra.gmra.mrb[12].mxu1 %vm1759_vm3, %v1743_v45  ;;  %v3294_v45 = vld [vmem:[%s4464_s6 + $0x20] sm:$0xff] }
 0xd8e   : > { %3550 = vmatprep.mubr.msk.f32.mxu1 %vm3845_vm1, %v3846_v13 }
 0xe60   : > { %v1829_v47 = vpop.f32.mrb[12].mxu1 }
 0xe61   : > { %v1830_v48 = vadd.f32 %v3283_v46, %v1829_v47  ;;  %v3531_v49 = vpop.f32.mrb[13].mxu1 }
 0xe63   : > { %v1833_v50 = vadd.f32 %v1830_v48, %v1650_v17 }
 0xe65   : > { %v1836_v51 = vsel %vm533_vm0, %v1833_v50, 0.0 }
 0xe66   : > { %1837 = vadd.xlane.f32.xlu1 %v1836_v51 }
 0xef3   : > { %v1838_v52 = vpop.xlane.xlu1 %1837 }
 0xef4   : > { %v1839_v26 = vmul.f32 0.03125, %v1838_v52 }
 0xef6   : > { %v1840_v53 = vsub.f32 %v1833_v50, %v1839_v26 }
 0xef8   : > { %v1841_v54 = vmul.f32 %v1840_v53, %v1840_v53 }
 0xefa   : > { %v1842_v55 = vsel %vm533_vm0, %v1841_v54, 0.0 }
 0xefb   : > { %1843 = vadd.xlane.f32.xlu1 %v1842_v55 }
 0xf88   : > { %v1844_v62 = vpop.xlane.xlu1 %1843 }
 0xf89   : > { %v1845_v63 = vmul.f32 0.03125, %v1844_v62 }
 0xf8b   : > { %v1846_v0 = vadd.f32 1e-12, %v1845_v63 }
 0xf8d   : > { %3756 = vrsqrt.f32 %v1846_v0 }
 0xf97   : > { %v3757_v1 = vpop.eup %3756 }
 0xf98   : > { %v1848_v3 = vmul.f32 %v3757_v1, %v1840_v53 }
 0xf9a   : > { %v1855_v23 = vmul.f32 %v3285_v2, %v1848_v3 }
 0xf9c   : > { %v4232_v5 = vadd.f32 %v3286_v4, %v1855_v23 }
 0xf9e   : > { %3541 = vmatmul.mubr.msk.f32.vlgmr.msra.gmra.mrb[16].mxu0 %vm533_vm0, %v4232_v5 }
 0xf9f   : > { %3545 = vmatprep.mubr.msk.f32.mxu0 %vm3845_vm1, %v3846_v13 }
0x1071   : > { %v1945_v7 = vpop.f32.mrb[16].mxu0 }
0x1072   : > { %v4241_v8 = vadd.f32 %v3292_v6, %v1945_v7  ;;  %v3542_v9 = vpop.f32.mrb[17].mxu0  ;;  %v3296_v7 = vld [vmem:[%s4464_s6 + $0x30] sm:$0xff] }
0x1074   : > { %2120 = vrot.lane.b32.xlu0 %v4241_v8, %s3849_s28  ;;  %1955 = vrot.lane.b32.xlu1 %v4241_v8, %s3848_s26  ;;  %s4499_s26 = smov 56   ;;  %s4500_s28 = smov 80  }
0x1078   : > { %2118 = vrot.lane.b32.xlu0 %v4241_v8, %s4498_s23  ;;  %s4504_s23 = smov 104  }
0x10e6   : > { %v1956_v11 = vpop.permute.xlu1 %1955  ;;  %v2121_v12 = vpop.permute.xlu0 %2120 }
0x10e7   : > { %3544 = vmatpush3.xpose.msk.msra.mxu0 %vm662_vm2, %v1956_v11 }
0x10e8   : > { %3553 = vmatprep.subr.mxu0 %v3846_v13 }
0x10ea   : > { %3546 = vmatmul.mubr.msk.f32.vlgmr.msra.gmra.mrb[18].mxu0 %vm662_vm2, %v4241_v8  ;;  %v2119_v14 = vpop.permute.xlu0 %2118 }
0x10eb   : > { %3554 = vmatpush3.xpose.msk.msra.mxu0 %vm662_vm2, %v2121_v12  ;;  %3555 = vmatprep.mubr.msk.f32.mxu0 %vm3845_vm1, %v3846_v13 }
0x10ec   : > { %3563 = vmatprep.subr.mxu0 %v3846_v13 }
0x10ee   : > { %3556 = vmatmul.mubr.msk.f32.vlgmr.msra.gmra.mrb[20].mxu0 %vm662_vm2, %v2119_v14 }
0x10ef   : > { %3565 = vmatprep.mubr.msk.f32.mxu0 %vm3845_vm1, %v3846_v13  ;;  %3564 = vmatpush3.msra.mxu0 %v3295_v35 }
0x10f0   : > { %3573 = vmatprep.subr.mxu0 %v3846_v13 }
0x11bd   : > { %v2027_v15 = vpop.f32.mrb[18].mxu0 }
0x11be   : > { %v2028_v16 = vadd.f32 %v2027_v15, %v4060_v37  ;;  %v3547_v17 = vpop.f32.mrb[19].mxu0 }
0x11c0   : > { %v2031_v18 = vsel %vm662_vm2, %v2028_v16, -inf }
0x11c1   : > { %2032 = vmax.xlane.f32.xlu0 %v2031_v18  ;;  %v2192_v19 = vpop.f32.mrb[20].mxu0 }
0x11c2   : > { %v2193_v20 = vadd.f32 %v2192_v19, %v4060_v37  ;;  %v3557_v21 = vpop.f32.mrb[21].mxu0 }
0x11c4   : > { %v2196_v22 = vsel %vm662_vm2, %v2193_v20, -inf }
0x11c5   : > { %2197 = vmax.xlane.f32.xlu1 %v2196_v22 }
0x11d6   : > { %2207 = vrot.lane.b32.xlu1 %v4241_v8, %s4499_s26  ;;  %s4505_s26 = smov 48  }
0x11da   : > { %2431 = vrot.lane.b32.xlu1 %v4241_v8, %s4500_s28  ;;  %s3177_s28 = scalar_lea.sflag [#allocation3], %s521_s27 }
0x124e   : > { %v2033_v24 = vpop.xlane.xlu0 %2032 }
0x124f   : > { %v2034_v25 = vsub.f32 %v2028_v16, %v2033_v24 }
0x1251   : > { %v2035_v27 = vmul.f32 1.442695, %v2034_v25 }
0x1252   : > { %v2198_v28 = vpop.xlane.xlu1 %2197 }
0x1253   : > { %3758 = vpow2.f32 %v2035_v27  ;;  %v2199_v29 = vsub.f32 %v2193_v20, %v2198_v28 }
0x1255   : > { %v2200_v30 = vmul.f32 1.442695, %v2199_v29 }
0x1256   : > { %v2208_v42 = vpop.permute.xlu1 %2207 }
0x1257   : > { %3760 = vpow2.f32 %v2200_v30 }
0x125a   : > { %v2432_v49 = vpop.permute.xlu1 %2431 }
0x125d   : > { %v3759_v31 = vpop.eup %3758 }
0x125e   : > { %v2037_v32 = vsel %vm662_vm2, %v3759_v31, 0.0 }
0x125f   : > { %2038 = vadd.xlane.f32.xlu0 %v2037_v32 }
0x1261   : > { %v3761_v33 = vpop.eup %3760 }
0x1262   : > { %v2202_v34 = vsel %vm662_vm2, %v3761_v33, 0.0 }
0x1263   : > { %2203 = vadd.xlane.f32.xlu0 %v2202_v34 }
0x1279   : > { %2042 = vrot.lane.b32.xlu0 %v4241_v8, %s4501_s30  ;;  %s3780_s30 = scalar_lea.vmem %s4418_s20, 16 }
0x127a   : > { %p3781_p11 = scmp.ne.s32.totalorder %s4418_s20, %s3780_s30 }
0x127c   : > { %p3782_p12 = pnand %p3781_p11, %p3982_p5 }
0x127d   : > { %2429 = vrot.lane.b32.xlu0 %v4241_v8, %s4502_s19  ;;  %s4506_s19 = smov 40  }
0x127e   : > { %p3783_p13 = pneg %p3782_p12 }
0x12ec   : > { %v2039_v36 = vpop.xlane.xlu0 %2038 }
0x12ed   : > { %3762 = vrcp.f32 %v2039_v36 }
0x12f0   : > { %v2204_v38 = vpop.xlane.xlu0 %2203 }
0x12f1   : > { %3764 = vrcp.f32 %v2204_v38 }
0x12f4   : > { %v2043_v39 = vpop.permute.xlu0 %2042 }
0x12f5   : > { %3549 = vmatpush3.msra.mxu1 %v2043_v39 }
0x12f6   : > { %3558 = vmatprep.subr.mxu1 %v3846_v13 }
0x12f7   : > { %v3763_v40 = vpop.eup %3762 }
0x12f8   : > { %v2041_v41 = vmul.f32 %v3763_v40, %v3759_v31  ;;  %v2430_v51 = vpop.permute.xlu0 %2429 }
0x12fa   : > { %3551 = vmatmul.mubr.msk.f32.vlgmr.msra.gmra.mrb[14].mxu1 %vm662_vm2, %v2041_v41 }
0x12fb   : > { %v3765_v43 = vpop.eup %3764  ;;  %3559 = vmatpush3.msra.mxu1 %v2208_v42  ;;  %3560 = vmatprep.mubr.msk.f32.mxu1 %vm3845_vm1, %v3846_v13 }
0x12fc   : > { %v2206_v44 = vmul.f32 %v3765_v43, %v3761_v33  ;;  %3568 = vmatprep.subr.mxu1 %v3846_v13  ;;  %v3315_v33 = vld [vmem:[%s4465_s7 + $0x1] ss:$0 sm:$0xff] }
0x12fe   : > { %3561 = vmatmul.mubr.msk.f32.vlgmr.msra.gmra.mrb[16].mxu1 %vm662_vm2, %v2206_v44 }
0x12ff   : > { %3570 = vmatprep.mubr.msk.f32.mxu1 %vm3845_vm1, %v3846_v13  ;;  %3569 = vmatpush3.msra.mxu1 %v3294_v45  ;;  %v3321_v45 = vld [vmem:[%s4468_s10 + $0x28] sm:$0xff] }
0x1300   : > { %3578 = vmatprep.subr.mxu1 %v3846_v13 }
0x13cd   : > { %v2114_v46 = vpop.f32.mrb[14].mxu1 }
0x13ce   : > { %v3552_v47 = vpop.f32.mrb[15].mxu1  ;;  %3571 = vmatmul.mubr.msk.f32.vlgmr.msra.gmra.mrb[18].mxu1 %vm662_vm2, %v2114_v46 }
0x13cf   : > { %3580 = vmatprep.mubr.msk.f32.mxu1 %vm3845_vm1, %v3846_v13  ;;  %v3323_v47 = vld [vmem:[%s4468_s10 + $0x38] sm:$0xff] }
0x13d1   : > { %v2279_v48 = vpop.f32.mrb[16].mxu1 }
0x13d2   : > { %v3562_v50 = vpop.f32.mrb[17].mxu1  ;;  %3566 = vmatmul.mubr.msk.f32.vlgmr.msra.gmra.mrb[22].mxu0 %vm662_vm2, %v2279_v48 }
0x13d3   : > { %3574 = vmatpush3.xpose.msk.msra.mxu0 %vm662_vm2, %v2432_v49  ;;  %3575 = vmatprep.mubr.msk.f32.mxu0 %vm3845_vm1, %v3846_v13 }
0x13d4   : > { %3583 = vmatprep.subr.mxu0 %v3846_v13 }
0x13d6   : > { %3576 = vmatmul.mubr.msk.f32.vlgmr.msra.gmra.mrb[24].mxu0 %vm662_vm2, %v2430_v51 }
0x13d7   : > { %3585 = vmatprep.mubr.msk.f32.mxu0 %vm3845_vm1, %v3846_v13  ;;  %3584 = vmatpush3.msra.mxu0 %v3296_v7 }
0x13d8   : > { %3593 = vmatprep.subr.mxu0 %v3846_v13 }
0x14a1   : > { %v2425_v52 = vpop.f32.mrb[18].mxu1 }
0x14a2   : > { %v3572_v26 = vpop.f32.mrb[19].mxu1 }
0x14a3   : > { %v3318_v26 = vld [vmem:[%s4466_s8 + $0x1] ss:$0 sm:$0xff] }
0x14a5   : > { %v2352_v53 = vpop.f32.mrb[22].mxu0 }
0x14a6   : > { %v2426_v54 = vadd.f32 %v2425_v52, %v2352_v53  ;;  %v3567_v55 = vpop.f32.mrb[23].mxu0 }
0x14a9   : > { %v2503_v56 = vpop.f32.mrb[24].mxu0 }
0x14aa   : > { %v2504_v57 = vadd.f32 %v2503_v56, %v4060_v37  ;;  %v3577_v58 = vpop.f32.mrb[25].mxu0 }
0x14ab   : > { %v3328_v58 = vld [vmem:[%s4470_s12 + $0x48] sm:$0xff] }
0x14ac   : > { %v2507_v59 = vsel %vm662_vm2, %v2504_v57, -inf }
0x14ad   : > { %2508 = vmax.xlane.f32.xlu1 %v2507_v59 }
0x14be   : > { %2670 = vrot.lane.b32.xlu1 %v4241_v8, %s4503_s18 }
0x14c2   : > { %2668 = vrot.lane.b32.xlu1 %v4241_v8, %s4504_s23 }
0x153a   : > { %v2509_v60 = vpop.xlane.xlu1 %2508 }
0x153b   : > { %v2510_v61 = vsub.f32 %v2504_v57, %v2509_v60  ;;  %v3327_v57 = vld [vmem:[%s4470_s12 + $0x40] sm:$0xff]  ;;  %v3329_v60 = vld [vmem:[%s4470_s12 + $0x50] sm:$0xff] }
0x153c   : > { %v3670_v59 = vpack.c.bf16 %v3328_v58, %v3327_v57 }
0x153d   : > { %v2511_v62 = vmul.f32 1.442695, %v2510_v61  ;;  %v3330_v61 = vld [vmem:[%s4470_s12 + $0x58] sm:$0xff] }
0x153e   : > { %v2671_v4 = vpop.permute.xlu1 %2670 }
0x153f   : > { %3766 = vpow2.f32 %v2511_v62  ;;  %v3673_v62 = vpack.c.bf16 %v3330_v61, %v3329_v60 }
0x1542   : > { %v2669_v6 = vpop.permute.xlu1 %2668 }
0x1549   : > { %v3767_v63 = vpop.eup %3766 }
0x154a   : > { %v2513_v0 = vsel %vm662_vm2, %v3767_v63, 0.0 }
0x154b   : > { %2514 = vadd.xlane.f32.xlu0 %v2513_v0  ;;  %v3332_v0 = vld [vmem:[%s4470_s12 + $0x68] sm:$0xff] }
0x1561   : > { %2518 = vrot.lane.b32.xlu0 %v4241_v8, %s4505_s26  ;;  %s4416_s26 = scalar_lea.hbm %s4474_s16, %s3342_s17 }
0x15d8   : > { %v2515_v1 = vpop.xlane.xlu0 %2514 }
0x15d9   : > { %3768 = vrcp.f32 %v2515_v1 }
0x15dc   : > { %v2519_v2 = vpop.permute.xlu0 %2518 }
0x15dd   : > { %3579 = vmatpush3.msra.mxu1 %v2519_v2  ;;  %v3333_v2 = vld [vmem:[%s4470_s12 + $0x70] sm:$0xff] }
0x15de   : > { %3588 = vmatprep.subr.mxu1 %v3846_v13 }
0x15e3   : > { %v3769_v3 = vpop.eup %3768 }
0x15e4   : > { %v2517_v23 = vmul.f32 %v3769_v3, %v3767_v63  ;;  %v3331_v63 = vld [vmem:[%s4470_s12 + $0x60] sm:$0xff]  ;;  %v3334_v3 = vld [vmem:[%s4470_s12 + $0x78] sm:$0xff] }
0x15e5   : > { %v3676_v1 = vpack.c.bf16 %v3332_v0, %v3331_v63 }
0x15e6   : > { %3581 = vmatmul.mubr.msk.f32.vlgmr.msra.gmra.mrb[20].mxu1 %vm662_vm2, %v2517_v23  ;;  %v3325_v23 = vld [vmem:[%s4469_s11 + $0x1] ss:$0 sm:$0xff] }
0x15e7   : > { %3589 = vmatpush3.xpose.msk.msra.mxu1 %vm662_vm2, %v2671_v4  ;;  %3590 = vmatprep.mubr.msk.f32.mxu1 %vm3845_vm1, %v3846_v13  ;;  %v3679_v4 = vpack.c.bf16 %v3334_v3, %v3333_v2 }
0x15e8   : > { %3598 = vmatprep.subr.mxu1 %v3846_v13 }
0x15ea   : > { %3591 = vmatmul.mubr.msk.f32.vlgmr.msra.gmra.mrb[22].mxu1 %vm662_vm2, %v2669_v6 }
0x15eb   : > { %3600 = vmatprep.mubr.msk.f32.mxu1 %vm3845_vm1, %v3846_v13 }
0x16b9   : > { %v2590_v9 = vpop.f32.mrb[20].mxu1 }
0x16ba   : > { %v3582_v11 = vpop.f32.mrb[21].mxu1  ;;  %3586 = vmatmul.mubr.msk.f32.vlgmr.msra.gmra.mrb[26].mxu0 %vm662_vm2, %v2590_v9 }
0x16bb   : > { %3595 = vmatprep.mubr.msk.f32.mxu0 %vm3845_vm1, %v3846_v13 }
0x16bd   : > { %v2742_v12 = vpop.f32.mrb[22].mxu1 }
0x16be   : > { %v2743_v14 = vadd.f32 %v2742_v12, %v4060_v37  ;;  %v3592_v15 = vpop.f32.mrb[23].mxu1  ;;  %v3297_v37 = vld [vmem:[%s4464_s6 + $0x38] sm:$0xff] }
0x16bf   : > { %3599 = vmatpush3.msra.mxu1 %v3297_v37 }
0x16c0   : > { %v2746_v16 = vsel %vm662_vm2, %v2743_v14, -inf  ;;  %3669 = vmatprep.subr.bf16.mxu1 %v3844_v10 }
0x16c1   : > { %2747 = vmax.xlane.f32.xlu0 %v2746_v16 }
0x16d7   : > { %2757 = vrot.lane.b32.xlu0 %v4241_v8, %s4506_s19  ;;  %s3784_s19 = sshll.u32 %s3858_s25, 4  ;;  %s3785_s19 = int_to_ptr.vmem [resolvable:$false] %s3784_s19 }
0x16d8   : > { %s3786_s1 = scalar_lea.vmem %s3785_s19, 32  ;;  %p3787_p0 = scmp.lt.s32.totalorder %s4418_s20, %s3785_s19 }
0x16d9   : > { %p3788_p1 = scmp.lt.s32.totalorder %s3786_s1, %s3780_s30 }
0x16db   : > { %p3789_p2 = por %p3788_p1, %p3787_p0 }
0x16dd   : > { %p3790_p3 = pnand %p3789_p2, %p3783_p13 }
0x174e   : > { %v2748_v17 = vpop.xlane.xlu0 %2747 }
0x174f   : > { %v2749_v18 = vsub.f32 %v2743_v14, %v2748_v17 }
0x1751   : > { %v2750_v19 = vmul.f32 1.442695, %v2749_v18 }
0x1752   : > { %v2758_v20 = vpop.permute.xlu0 %2757 }
0x1753   : > { %3770 = vpow2.f32 %v2750_v19  ;;  %3594 = vmatpush3.msra.mxu0 %v2758_v20  ;;  %v3336_v20 = vld [vmem:[%s4471_s13 + $0x1] ss:$0 sm:$0xff] }
0x1754   : > { %3663 = vmatprep.subr.bf16.mxu0 %v3844_v10 }
0x175d   : > { %v3771_v21 = vpop.eup %3770 }
0x175e   : > { %v2752_v22 = vsel %vm662_vm2, %v3771_v21, 0.0 }
0x175f   : > { %2753 = vadd.xlane.f32.xlu1 %v2752_v22 }
0x178d   : > { %v2663_v8 = vpop.f32.mrb[26].mxu0 }
0x178e   : > { %v2667_v24 = vadd.f32 %v2663_v8, %v2426_v54  ;;  %v3587_v25 = vpop.f32.mrb[27].mxu0  ;;  %v3319_v54 = vld [vmem:[%s4467_s9 + $0x1] ss:$0 sm:$0xff] }
0x17ec   : > { %v2754_v27 = vpop.xlane.xlu1 %2753 }
0x17ed   : > { %3772 = vrcp.f32 %v2754_v27 }
0x17f7   : > { %v3773_v28 = vpop.eup %3772 }
0x17f8   : > { %v2756_v29 = vmul.f32 %v3773_v28, %v3771_v21 }
0x17fa   : > { %3596 = vmatmul.mubr.msk.f32.vlgmr.msra.gmra.mrb[28].mxu0 %vm662_vm2, %v2756_v29 }
0x17fb   : > { %3611 = vmatprep.mubr.msk.f32.mxu0 %vm3845_vm1, %v3846_v13 }
0x18cd   : > { %v2829_v30 = vpop.f32.mrb[28].mxu0 }
0x18ce   : > { %v3597_v31 = vpop.f32.mrb[29].mxu0  ;;  %3601 = vmatmul.mubr.msk.f32.vlgmr.msra.gmra.mrb[24].mxu1 %vm662_vm2, %v2829_v30 }
0x18cf   : > { %3630 = vmatprep.mubr.msk.f32.mxu1 %vm3845_vm1, %v3846_v13  ;;  %v3320_v13 = vld [vmem:[%s4468_s10 + $0x20] sm:$0xff]  ;;  %3671 = vmatpush3.bf16.msra.mxu1 %v3670_v59 }
0x18d0   : > { %v3664_v46 = vpack.c.bf16 %v3321_v45, %v3320_v13  ;;  %3672 = vmatprep.subr.bf16.mxu1 %v3844_v10 }
0x18d2   : > { %3665 = vmatpush3.bf16.msra.mxu0 %v3664_v46 }
0x18d3   : > { %3666 = vmatprep.subr.bf16.mxu0 %v3844_v10  ;;  %3674 = vmatpush3.bf16.msra.mxu1 %v3673_v62 }
0x18d4   : > { %3675 = vmatprep.subr.bf16.mxu1 %v3844_v10 }
0x18d7   : > { %3677 = vmatpush3.bf16.msra.mxu1 %v3676_v1 }
0x18d8   : > { %3678 = vmatprep.subr.bf16.mxu1 %v3844_v10 }
0x18db   : > { %3680 = vmatpush3.bf16.msra.mxu1 %v3679_v4 }
0x19a1   : > { %v2902_v32 = vpop.f32.mrb[24].mxu1 }
0x19a2   : > { %v2906_v34 = vadd.f32 %v2902_v32, %v2667_v24  ;;  %v3602_v35 = vpop.f32.mrb[25].mxu1 }
0x19a3   : > { %v3340_v35 = vld [vmem:[%s4472_s14 + $0x1] ss:$0 sm:$0xff] }
0x19a4   : > { %v2915_v36 = vadd.f32 %v3315_v33, %v2906_v34 }
0x19a6   : > { %v2916_v38 = vadd.f32 %v2915_v36, %v4232_v5  ;;  %v3322_v5 = vld [vmem:[%s4468_s10 + $0x30] sm:$0xff] }
0x19a7   : > { %v3667_v48 = vpack.c.bf16 %v3323_v47, %v3322_v5 }
0x19a8   : > { %v2921_v39 = vsel %vm533_vm0, %v2916_v38, 0.0 }
0x19a9   : > { %2922 = vadd.xlane.f32.xlu1 %v2921_v39  ;;  %3668 = vmatpush3.bf16.msra.mxu0 %v3667_v48 }
0x1a36   : > { %v2923_v40 = vpop.xlane.xlu1 %2922 }
0x1a37   : > { %v2924_v41 = vmul.f32 0.03125, %v2923_v40 }
0x1a39   : > { %v2925_v42 = vsub.f32 %v2916_v38, %v2924_v41  ;;  %v3341_v38 = vld [vmem:[%s4473_s15 + $0x1] ss:$0 sm:$0xff] }
0x1a3b   : > { %v2926_v43 = vmul.f32 %v2925_v42, %v2925_v42 }
0x1a3d   : > { %v2927_v44 = vsel %vm533_vm0, %v2926_v43, 0.0 }
0x1a3e   : > { %2928 = vadd.xlane.f32.xlu1 %v2927_v44 }
0x1acb   : > { %v2929_v49 = vpop.xlane.xlu1 %2928 }
0x1acc   : > { %v2930_v50 = vmul.f32 0.03125, %v2929_v49 }
0x1ace   : > { %v2931_v51 = vadd.f32 1e-12, %v2930_v50 }
0x1ad0   : > { %3774 = vrsqrt.f32 %v2931_v51 }
0x1ada   : > { %v3775_v52 = vpop.eup %3774 }
0x1adb   : > { %v2933_v53 = vmul.f32 %v3775_v52, %v2925_v42 }
0x1add   : > { %v2940_v55 = vmul.f32 %v3318_v26, %v2933_v53 }
0x1adf   : > { %v2947_v56 = vadd.f32 %v3319_v54, %v2940_v55 }
0x1ae1   : > { %3612 = vmatmul.mubr.msk.f32.vlgmr.msra.gmra.mrb[30].mxu0 %vm533_vm0, %v2947_v56 }
0x1bb4   : > { %v3030_v6 = vpop.f32.mrb[30].mxu0 }
0x1bb5   : > { %v3031_v7 = vadd.f32 %v3325_v23, %v3030_v6  ;;  %v3613_v9 = vpop.f32.mrb[31].mxu0 }
0x1bb7   : > { %v3034_v11 = vmul.f32 %v3031_v7, %v3031_v7 }
0x1bb9   : > { %v3035_v12 = vmul.f32 %v3034_v11, %v3031_v7 }
0x1bbb   : > { %v3036_v10 = vmul.f32 0.044715, %v3035_v12 }
0x1bbd   : > { %v3037_v14 = vadd.f32 %v3036_v10, %v3031_v7 }
0x1bbf   : > { %v3038_v15 = vmul.f32 0.7978846, %v3037_v14 }
0x1bc1   : > { %3776 = vtanh.f32 %v3038_v15 }
0x1bcb   : > { %v3777_v16 = vpop.eup %3776 }
0x1bcc   : > { %v3040_v17 = vadd.f32 1.0, %v3777_v16 }
0x1bce   : > { %v3041_v18 = vmul.f32 0.5, %v3040_v17 }
0x1bd0   : > { %v3042_v19 = vmul.f32 %v3041_v18, %v3031_v7 }
0x1bd2   : > { %3631 = vmatmul.mubr.msk.f32.vlgmr.msra.gmra.mrb[26].mxu1 %vm1759_vm3, %v3042_v19 }
0x1ca5   : > { %v3129_v21 = vpop.f32.mrb[26].mxu1 }
0x1ca6   : > { %v3130_v22 = vadd.f32 %v3336_v20, %v3129_v21  ;;  %v3632_v37 = vpop.f32.mrb[27].mxu1 }
0x1ca8   : > { %v3133_v8 = vadd.f32 %v3130_v22, %v2947_v56 }
0x1caa   : > { %v3138_v24 = vsel %vm533_vm0, %v3133_v8, 0.0 }
0x1cab   : > { %3139 = vadd.xlane.f32.xlu1 %v3138_v24 }
0x1d38   : > { %v3140_v25 = vpop.xlane.xlu1 %3139 }
0x1d39   : > { %v3141_v27 = vmul.f32 0.03125, %v3140_v25 }
0x1d3b   : > { %v3142_v28 = vsub.f32 %v3133_v8, %v3141_v27 }
0x1d3d   : > { %v3143_v29 = vmul.f32 %v3142_v28, %v3142_v28 }
0x1d3f   : > { %v3144_v30 = vsel %vm533_vm0, %v3143_v29, 0.0 }
0x1d40   : > { %3145 = vadd.xlane.f32.xlu1 %v3144_v30 }
0x1dcd   : > { %v3146_v31 = vpop.xlane.xlu1 %3145 }
0x1dce   : > { %v3147_v32 = vmul.f32 0.03125, %v3146_v31 }
0x1dd0   : > { %v3148_v33 = vadd.f32 1e-12, %v3147_v32 }
0x1dd2   : > { %3778 = vrsqrt.f32 %v3148_v33 }
0x1ddc   : > { %v3779_v34 = vpop.eup %3778 }
0x1ddd   : > { %v3150_v36 = vmul.f32 %v3779_v34, %v3142_v28 }
0x1ddf   : > { %v3157_v39 = vmul.f32 %v3340_v35, %v3150_v36 }
0x1de1   : > { %v3164_v40 = vadd.f32 %v3341_v38, %v3157_v39 }
0x1de3   : > { %v3165_v41 = vsel %vm533_vm0, %v3164_v40, 0.0 }
0x1de4   : > { %v3166_v42 = vrot.slane %v3165_v41, 4 }
0x1de6   : > { %v3167_v43 = vadd.f32 %v3166_v42, %v3165_v41 }
0x1de8   : > { %v3168_v44 = vrot.slane %v3167_v43, 2 }
0x1dea   : > { %v3169_v13 = vadd.f32 %v3168_v44, %v3167_v43 }
0x1dec   : > { %v3170_v45 = vrot.slane %v3169_v13, 1 }
0x1dee   : > { %v3171_v46 = vadd.f32 %v3170_v45, %v3169_v13 }
0x1df0   : > { %v3173_v5 = vmul.f32 0.125, %v3171_v46 }
0x1df2   : > { %3175 = vst.msk [vmem:[%s522_s29] sm:$0x1] %vm3174_vm4, %v3173_v5 }
0x1df3   : > { %3793 = shalt.err (!%p3790_p3)
}
0x1df4   : > { %s3794_s27 = scalar_lea.hbm %s4416_s26, 16  ;;  %s3798_s18 = scalar_lea.hbm %s4474_s16, 32 }
0x1df5   : > { %p3795_p4 = scmp.ne.s32.totalorder %s4416_s26, %s3794_s27  ;;  %p3799_p9 = scmp.lt.u32.totalorder %s4416_s26, %s4474_s16 }
0x1df6   : > { %p3800_p10 = scmp.lt.u32.totalorder %s3798_s18, %s3794_s27  ;;  %p3802_p12 = scmp.lt.u32.totalorder %s3794_s27, %s4416_s26 }
0x1df7   : > { %p3796_p7 = pnand %p3795_p4, %p3982_p5 }
0x1df8   : > { %p3801_p11 = por %p3800_p10, %p3799_p9 }
0x1df9   : > { %p3797_p8 = pneg %p3796_p7 }
0x1dfa   : > { %p3803_p13 = por %p3802_p12, %p3801_p11 }
0x1dfc   : > { %p3804_p0 = pnand %p3803_p13, %p3797_p8 }
0x1dfe   : > { %3807 = shalt.err (!%p3804_p0)
}
0x1dff   : > { %3681 = dma.vmem_to_hbm [thread:$0]  (%p3982_p5), %s4418_s20, 16, %s4416_s26, %s3177_s28  }
0x1e00 PF: > { %p3687_p1 = scmp.ge.s32.totalorder %s3842_s24, 2  ;;  %s3201_s30 = sand.u32 1, %s3830_s21  }
0x1e01   : > { %s3202_s19 = scalar_lea.sflag [#allocation3], %s3201_s30 }
0x1e02   : > { %p3684_p2 = pnand %p3687_p1, %p3986_p6 }
0x1e04   : > { %3825 = dma.done.wait (!%p3684_p2), %s3202_s19, 16  }
0x1e05   : > { %3827 = vsyncadd (!%p3684_p2), %s3202_s19, 4294967280  ;;  %s4508_s24 = sld [smem:[#allocation6_spill]]  ;;  %s4509_s27 = sld [smem:[#allocation5_spill]] }
0x1e06   : > { %s4510_s23 = sld [smem:[#allocation7_spill]]  ;;  %s4511_s21 = smov %s3834_s22 }
0x1e0b   : > { %p26_p3 = scmp.ge.s32.totalorder %s4508_s24, 4   ;;  %s4512_s22 = smov %s4509_s27 }
0x1e0d   :  { %28 = sbr.rel (!%p26_p3) target bundleno = 6 (0x6), region = 134 }
0x1e14   :  { %3206 = vsyncpa [#allocation3], 1 }
0x1e15   :  { %3208 = vsyncpa [#allocation3 + $0x1], 1 }

</bundles_post_ra>
